<compile_context>
chip_gen: v6e
topology: v6e:2x2x1
jax: 0.10.0
libtpu: 0.0.40
codegen_flags: <defaults>
</compile_context>

<pallas_src>
import jax
import jax.numpy as jnp
from jax.experimental import pallas as pl
from jax.experimental.pallas import tpu as pltpu

BN_EPS = 1e-5
LANE = 128


def _mlp_kernel(x_ref,
                w1_ref, g1_ref, be1_ref,
                w2_ref, g2_ref, be2_ref,
                w3_ref, g3_ref, be3_ref,
                wo_ref, bo_ref,
                o_ref):
    """Fused MLP: 3 x (Linear -> BN(batch stats) -> ReLU) -> Linear (+bias).

    Pre-BN Linear biases are omitted: BatchNorm's mean subtraction cancels any
    per-feature constant added before it, so only the final Linear keeps its
    bias.  Matmuls run on the MXU in bf16 with f32 accumulation; all BN/ReLU
    math stays f32 (v5e has no bf16 VPU/EUP).
    """

    def matmul(h_bf16, w_ref):
        # MXU matmul, bf16 inputs, f32 accumulation.
        return jnp.dot(h_bf16, w_ref[...], preferred_element_type=jnp.float32)

    def bn_relu(h, g_ref, be_ref):
        # Two-pass (centered) variance: matches PyTorch's (h - mu)^2 form and
        # avoids the catastrophic-cancellation risk of mean(h*h) - mu^2.  The
        # affine is folded so the apply is one mul + add + max per element.
        mu = jnp.mean(h, axis=0, keepdims=True)                  # [1, W]
        c = h - mu                                               # [B, W]
        var = jnp.mean(c * c, axis=0, keepdims=True)             # [1, W]
        scale = g_ref[...] * jax.lax.rsqrt(var + BN_EPS)         # [1, W]
        return jnp.maximum(c * scale + be_ref[...], 0.0).astype(jnp.bfloat16)

    h = matmul(x_ref[...].astype(jnp.bfloat16), w1_ref)     # pre-BN bias cancelled
    h = matmul(bn_relu(h, g1_ref, be1_ref), w2_ref)
    h = matmul(bn_relu(h, g2_ref, be2_ref), w3_ref)
    h = matmul(bn_relu(h, g3_ref, be3_ref), wo_ref)          # lane-dense padded proj
    o_ref[...] = (h + bo_ref[...]).astype(o_ref.dtype)


def prepare_params(params):
    """ONE-TIME weight prep (call outside the jitted forward).

    Casts Linear weights to bf16 for the MXU and zero-pads the output
    projection/bias to a 128-lane-dense width so the kernel's final store is
    an unmasked full-lane vst.  Hoisting this out of the per-call path keeps
    per-call HBM weight traffic to exactly one read of each weight."""
    width = params["w1"].shape[1]
    num_classes = params["wo"].shape[1]
    nc_pad = max(LANE, pl.cdiv(num_classes, LANE) * LANE)

    wo = jnp.zeros((width, nc_pad), jnp.bfloat16)
    wo = wo.at[:, :num_classes].set(params["wo"].astype(jnp.bfloat16))
    bo = jnp.zeros((1, nc_pad), jnp.float32).at[:, :num_classes].set(params["bo"])

    return {
        "w1": params["w1"].astype(jnp.bfloat16), "g1": params["g1"], "be1": params["be1"],
        "w2": params["w2"].astype(jnp.bfloat16), "g2": params["g2"], "be2": params["be2"],
        "w3": params["w3"].astype(jnp.bfloat16), "g3": params["g3"], "be3": params["be3"],
        "wo": wo, "bo": bo,
    }


def _vmem_limit_bytes(args, b, width, nc_pad):
    """Computed resident footprint + small margin (no 32 MiB floor), capped
    generation-aware at 3/4 of physical VMEM.  All static (trace-time) math."""
    operand_bytes = sum(int(a.size) * a.dtype.itemsize for a in args)
    act_bytes = 8 * b * width * 4          # live f32 [B, W] temporaries (generous)
    out_bytes = b * nc_pad * 4
    footprint = operand_bytes + act_bytes + out_bytes + (4 << 20)   # small margin

    try:
        vmem_cap = int(pltpu.get_tpu_info().vmem_capacity_bytes)
    except Exception:
        vmem_cap = 64 << 20                # conservative: v7x per-core VMEM
    budget = (vmem_cap * 3) // 4           # leave headroom for compiler scratch

    if footprint > budget:
        # TODO(synk): switch to the batch-tiled grid path (see header) instead
        # of clamping — clamping would silently spill on v7x's 64 MiB VMEM.
        raise NotImplementedError(
            f"fully-resident MLP kernel needs ~{footprint} B VMEM "
            f"(> {budget} B budget on this chip); tiled path not implemented")
    return int(footprint)


@jax.jit
def mlp_forward_padded(x, kp):
    """x: [B, input_size] float32.  kp: dict from prepare_params (bf16 weights,
    lane-padded output projection).  Returns lane-padded logits [B, nc_pad];
    the caller slices [:, :num_classes] (kept out of the jitted body so no
    per-call copy is emitted)."""
    b = x.shape[0]
    width = kp["w1"].shape[1]
    nc_pad = kp["wo"].shape[1]

    args = (
        x,
        kp["w1"], kp["g1"], kp["be1"],
        kp["w2"], kp["g2"], kp["be2"],
        kp["w3"], kp["g3"], kp["be3"],
        kp["wo"], kp["bo"],
    )

    vmem_spec = pl.BlockSpec(memory_space=pltpu.MemorySpace.VMEM)
    return pl.pallas_call(
        _mlp_kernel,
        out_shape=jax.ShapeDtypeStruct((b, nc_pad), jnp.float32),
        in_specs=[vmem_spec] * len(args),
        out_specs=vmem_spec,
        compiler_params=pltpu.CompilerParams(
            vmem_limit_bytes=_vmem_limit_bytes(args, b, width, nc_pad)),
    )(*args)


def init_params(key, input_size, width, num_classes):
    """PyTorch nn.Linear-style init (uniform +/- 1/sqrt(fan_in)); weights are
    stored as [in_features, out_features] (transposed vs torch)."""
    def linear_init(k, fan_in, fan_out):
        kw, kb = jax.random.split(k)
        bound = 1.0 / jnp.sqrt(fan_in)
        w = jax.random.uniform(kw, (fan_in, fan_out), jnp.float32, -bound, bound)
        bvec = jax.random.uniform(kb, (1, fan_out), jnp.float32, -bound, bound)
        return w, bvec

    k1, k2, k3, k4 = jax.random.split(key, 4)
    w1, b1 = linear_init(k1, input_size, width)
    w2, b2 = linear_init(k2, width, width)
    w3, b3 = linear_init(k3, width, width)
    wo, bo = linear_init(k4, width, num_classes)

    ones = jnp.ones((1, width), jnp.float32)
    zeros = jnp.zeros((1, width), jnp.float32)
    return {
        # b1/b2/b3 kept only to mirror the torch module / feed the f32 reference;
        # the kernel never consumes them (BN cancels them exactly).
        "w1": w1, "b1": b1, "g1": ones, "be1": zeros,
        "w2": w2, "b2": b2, "g2": ones, "be2": zeros,
        "w3": w3, "b3": b3, "g3": ones, "be3": zeros,
        "wo": wo, "bo": bo,
    }


def _reference_forward_f32(x, p):
    """Pure-JAX f32 reference mirroring the PyTorch forward exactly
    (train-mode BN, biases on every Linear)."""
    def bn_relu(h, g, be):
        mu = jnp.mean(h, axis=0, keepdims=True)
        var = jnp.mean((h - mu) ** 2, axis=0, keepdims=True)
        return jnp.maximum((h - mu) * jax.lax.rsqrt(var + BN_EPS) * g + be, 0.0)

    h = bn_relu(x @ p["w1"] + p["b1"], p["g1"], p["be1"])
    h = bn_relu(h @ p["w2"] + p["b2"], p["g2"], p["be2"])
    h = bn_relu(h @ p["w3"] + p["b3"], p["g3"], p["be3"])
    return h @ p["wo"] + p["bo"]


def _reference_forward_emulated(x, p):
    """Reference that mirrors the kernel's math exactly (bf16 matmul inputs,
    two-pass BN with folded affine, cancelled pre-BN biases)."""
    def matmul(h, w):
        return jnp.dot(h.astype(jnp.bfloat16), w.astype(jnp.bfloat16),
                       preferred_element_type=jnp.float32)

    def bn_relu(h, g, be):
        mu = jnp.mean(h, axis=0, keepdims=True)
        c = h - mu
        var = jnp.mean(c * c, axis=0, keepdims=True)
        return jnp.maximum(c * (g * jax.lax.rsqrt(var + BN_EPS)) + be, 0.0)

    h = matmul(x, p["w1"])
    h = matmul(bn_relu(h, p["g1"], p["be1"]), p["w2"])
    h = matmul(bn_relu(h, p["g2"], p["be2"]), p["w3"])
    h = matmul(bn_relu(h, p["g3"], p["be3"]), p["wo"])
    return h + p["bo"]


if __name__ == "__main__":
    # Width a multiple of 256 (fills the v6e/v7x 256x256 MXU per pass; v5e's
    # 128x128 MXU is saturated either way) and batch=128 so the MXU M
    # dimension is filled and weight loads are amortized.  Still tiny shapes.
    BATCH, INPUT_SIZE, WIDTH, NUM_CLASSES = 128, 256, 256, 10

    key = jax.random.PRNGKey(0)
    k_params, k_x = jax.random.split(key)
    params = init_params(k_params, INPUT_SIZE, WIDTH, NUM_CLASSES)
    kernel_params = prepare_params(params)       # one-time weight prep, outside jit
    x = jax.random.normal(k_x, (BATCH, INPUT_SIZE), jnp.float32)

    out_pad = jax.block_until_ready(mlp_forward_padded(x, kernel_params))
    assert out_pad.shape == (BATCH, kernel_params["wo"].shape[1])
    out = out_pad[:, :NUM_CLASSES]               # consumer-side slice (outside jit)

    # Tight check vs a reference that emulates the kernel's exact arithmetic.
    ref_emu = _reference_forward_emulated(x, params)
    assert jnp.allclose(out, ref_emu, atol=2e-3, rtol=2e-3), "mismatch vs emulated ref"

    # Loose check vs the pure-f32 PyTorch-equivalent forward (bf16 matmul error
    # + bias-cancellation rounding only).
    ref_f32 = _reference_forward_f32(x, params)
    assert jnp.allclose(out, ref_f32, atol=1e-1, rtol=1e-1), "mismatch vs f32 ref"

    print("KERNEL_OK")
</pallas_src>

<mosaic_0001>
module attributes {stable_mosaic.version = 11 : i64} {
  func.func @_mlp_kernel(%arg0: memref<128x256xf32, #tpu.memory_space<vmem>>, %arg1: memref<256x256xbf16, #tpu.memory_space<vmem>>, %arg2: memref<1x256xf32, #tpu.memory_space<vmem>>, %arg3: memref<1x256xf32, #tpu.memory_space<vmem>>, %arg4: memref<256x256xbf16, #tpu.memory_space<vmem>>, %arg5: memref<1x256xf32, #tpu.memory_space<vmem>>, %arg6: memref<1x256xf32, #tpu.memory_space<vmem>>, %arg7: memref<256x256xbf16, #tpu.memory_space<vmem>>, %arg8: memref<1x256xf32, #tpu.memory_space<vmem>>, %arg9: memref<1x256xf32, #tpu.memory_space<vmem>>, %arg10: memref<256x128xbf16, #tpu.memory_space<vmem>>, %arg11: memref<1x128xf32, #tpu.memory_space<vmem>>, %arg12: memref<128x128xf32, #tpu.memory_space<vmem>>) attributes {dimension_semantics = [], scalar_prefetch = 0 : i64, scratch_operands = 0 : i64, tpu.core_type = #tpu.core_type<tc>} {
    %c0 = arith.constant 0 : index
    %c0_0 = arith.constant 0 : index
    %0 = vector.load %arg0[%c0, %c0_0] : memref<128x256xf32, #tpu.memory_space<vmem>>, vector<128x256xf32>
    %1 = arith.truncf %0 : vector<128x256xf32> to vector<128x256xbf16>
    %c0_1 = arith.constant 0 : index
    %c0_2 = arith.constant 0 : index
    %2 = vector.load %arg1[%c0_1, %c0_2] : memref<256x256xbf16, #tpu.memory_space<vmem>>, vector<256x256xbf16>
    %cst = arith.constant dense<0.000000e+00> : vector<128x256xf32>
    %3 = tpu.matmul %1, %2, %cst {dimension_numbers = #tpu.dot_dimension_numbers<[1], [0], [0], [1], [0, 0, 1, 1], [], []>} : vector<128x256xbf16>, vector<256x256xbf16>, vector<128x256xf32> -> vector<128x256xf32>
    %cst_3 = arith.constant dense<0.000000e+00> : vector<256xf32>
    %4 = vector.multi_reduction <add>, %3, %cst_3 [0] : vector<128x256xf32> to vector<256xf32>
    %5 = vector.shape_cast %4 : vector<256xf32> to vector<1x256xf32>
    %cst_4 = arith.constant 1.280000e+02 : f32
    %6 = vector.broadcast %cst_4 : f32 to vector<1x256xf32>
    %7 = arith.divf %5, %6 : vector<1x256xf32>
    %8 = vector.broadcast %7 : vector<1x256xf32> to vector<128x256xf32>
    %9 = arith.subf %3, %8 : vector<128x256xf32>
    %10 = arith.mulf %9, %9 : vector<128x256xf32>
    %cst_5 = arith.constant dense<0.000000e+00> : vector<256xf32>
    %11 = vector.multi_reduction <add>, %10, %cst_5 [0] : vector<128x256xf32> to vector<256xf32>
    %12 = vector.shape_cast %11 : vector<256xf32> to vector<1x256xf32>
    %cst_6 = arith.constant 1.280000e+02 : f32
    %13 = vector.broadcast %cst_6 : f32 to vector<1x256xf32>
    %14 = arith.divf %12, %13 : vector<1x256xf32>
    %c0_7 = arith.constant 0 : index
    %c0_8 = arith.constant 0 : index
    %15 = vector.load %arg2[%c0_7, %c0_8] : memref<1x256xf32, #tpu.memory_space<vmem>>, vector<1x256xf32>
    %cst_9 = arith.constant 9.99999974E-6 : f32
    %16 = vector.broadcast %cst_9 : f32 to vector<1x256xf32>
    %17 = arith.addf %14, %16 : vector<1x256xf32>
    %18 = math.rsqrt %17 : vector<1x256xf32>
    %19 = arith.mulf %15, %18 : vector<1x256xf32>
    %20 = vector.broadcast %19 : vector<1x256xf32> to vector<128x256xf32>
    %21 = arith.mulf %9, %20 : vector<128x256xf32>
    %c0_10 = arith.constant 0 : index
    %c0_11 = arith.constant 0 : index
    %22 = vector.load %arg3[%c0_10, %c0_11] : memref<1x256xf32, #tpu.memory_space<vmem>>, vector<1x256xf32>
    %23 = vector.broadcast %22 : vector<1x256xf32> to vector<128x256xf32>
    %24 = arith.addf %21, %23 : vector<128x256xf32>
    %cst_12 = arith.constant 0.000000e+00 : f32
    %25 = vector.broadcast %cst_12 : f32 to vector<128x256xf32>
    %26 = arith.maximumf %24, %25 : vector<128x256xf32>
    %27 = arith.truncf %26 : vector<128x256xf32> to vector<128x256xbf16>
    %c0_13 = arith.constant 0 : index
    %c0_14 = arith.constant 0 : index
    %28 = vector.load %arg4[%c0_13, %c0_14] : memref<256x256xbf16, #tpu.memory_space<vmem>>, vector<256x256xbf16>
    %cst_15 = arith.constant dense<0.000000e+00> : vector<128x256xf32>
    %29 = tpu.matmul %27, %28, %cst_15 {dimension_numbers = #tpu.dot_dimension_numbers<[1], [0], [0], [1], [0, 0, 1, 1], [], []>} : vector<128x256xbf16>, vector<256x256xbf16>, vector<128x256xf32> -> vector<128x256xf32>
    %cst_16 = arith.constant dense<0.000000e+00> : vector<256xf32>
    %30 = vector.multi_reduction <add>, %29, %cst_16 [0] : vector<128x256xf32> to vector<256xf32>
    %31 = vector.shape_cast %30 : vector<256xf32> to vector<1x256xf32>
    %cst_17 = arith.constant 1.280000e+02 : f32
    %32 = vector.broadcast %cst_17 : f32 to vector<1x256xf32>
    %33 = arith.divf %31, %32 : vector<1x256xf32>
    %34 = vector.broadcast %33 : vector<1x256xf32> to vector<128x256xf32>
    %35 = arith.subf %29, %34 : vector<128x256xf32>
    %36 = arith.mulf %35, %35 : vector<128x256xf32>
    %cst_18 = arith.constant dense<0.000000e+00> : vector<256xf32>
    %37 = vector.multi_reduction <add>, %36, %cst_18 [0] : vector<128x256xf32> to vector<256xf32>
    %38 = vector.shape_cast %37 : vector<256xf32> to vector<1x256xf32>
    %cst_19 = arith.constant 1.280000e+02 : f32
    %39 = vector.broadcast %cst_19 : f32 to vector<1x256xf32>
    %40 = arith.divf %38, %39 : vector<1x256xf32>
    %c0_20 = arith.constant 0 : index
    %c0_21 = arith.constant 0 : index
    %41 = vector.load %arg5[%c0_20, %c0_21] : memref<1x256xf32, #tpu.memory_space<vmem>>, vector<1x256xf32>
    %cst_22 = arith.constant 9.99999974E-6 : f32
    %42 = vector.broadcast %cst_22 : f32 to vector<1x256xf32>
    %43 = arith.addf %40, %42 : vector<1x256xf32>
    %44 = math.rsqrt %43 : vector<1x256xf32>
    %45 = arith.mulf %41, %44 : vector<1x256xf32>
    %46 = vector.broadcast %45 : vector<1x256xf32> to vector<128x256xf32>
    %47 = arith.mulf %35, %46 : vector<128x256xf32>
    %c0_23 = arith.constant 0 : index
    %c0_24 = arith.constant 0 : index
    %48 = vector.load %arg6[%c0_23, %c0_24] : memref<1x256xf32, #tpu.memory_space<vmem>>, vector<1x256xf32>
    %49 = vector.broadcast %48 : vector<1x256xf32> to vector<128x256xf32>
    %50 = arith.addf %47, %49 : vector<128x256xf32>
    %cst_25 = arith.constant 0.000000e+00 : f32
    %51 = vector.broadcast %cst_25 : f32 to vector<128x256xf32>
    %52 = arith.maximumf %50, %51 : vector<128x256xf32>
    %53 = arith.truncf %52 : vector<128x256xf32> to vector<128x256xbf16>
    %c0_26 = arith.constant 0 : index
    %c0_27 = arith.constant 0 : index
    %54 = vector.load %arg7[%c0_26, %c0_27] : memref<256x256xbf16, #tpu.memory_space<vmem>>, vector<256x256xbf16>
    %cst_28 = arith.constant dense<0.000000e+00> : vector<128x256xf32>
    %55 = tpu.matmul %53, %54, %cst_28 {dimension_numbers = #tpu.dot_dimension_numbers<[1], [0], [0], [1], [0, 0, 1, 1], [], []>} : vector<128x256xbf16>, vector<256x256xbf16>, vector<128x256xf32> -> vector<128x256xf32>
    %cst_29 = arith.constant dense<0.000000e+00> : vector<256xf32>
    %56 = vector.multi_reduction <add>, %55, %cst_29 [0] : vector<128x256xf32> to vector<256xf32>
    %57 = vector.shape_cast %56 : vector<256xf32> to vector<1x256xf32>
    %cst_30 = arith.constant 1.280000e+02 : f32
    %58 = vector.broadcast %cst_30 : f32 to vector<1x256xf32>
    %59 = arith.divf %57, %58 : vector<1x256xf32>
    %60 = vector.broadcast %59 : vector<1x256xf32> to vector<128x256xf32>
    %61 = arith.subf %55, %60 : vector<128x256xf32>
    %62 = arith.mulf %61, %61 : vector<128x256xf32>
    %cst_31 = arith.constant dense<0.000000e+00> : vector<256xf32>
    %63 = vector.multi_reduction <add>, %62, %cst_31 [0] : vector<128x256xf32> to vector<256xf32>
    %64 = vector.shape_cast %63 : vector<256xf32> to vector<1x256xf32>
    %cst_32 = arith.constant 1.280000e+02 : f32
    %65 = vector.broadcast %cst_32 : f32 to vector<1x256xf32>
    %66 = arith.divf %64, %65 : vector<1x256xf32>
    %c0_33 = arith.constant 0 : index
    %c0_34 = arith.constant 0 : index
    %67 = vector.load %arg8[%c0_33, %c0_34] : memref<1x256xf32, #tpu.memory_space<vmem>>, vector<1x256xf32>
    %cst_35 = arith.constant 9.99999974E-6 : f32
    %68 = vector.broadcast %cst_35 : f32 to vector<1x256xf32>
    %69 = arith.addf %66, %68 : vector<1x256xf32>
    %70 = math.rsqrt %69 : vector<1x256xf32>
    %71 = arith.mulf %67, %70 : vector<1x256xf32>
    %72 = vector.broadcast %71 : vector<1x256xf32> to vector<128x256xf32>
    %73 = arith.mulf %61, %72 : vector<128x256xf32>
    %c0_36 = arith.constant 0 : index
    %c0_37 = arith.constant 0 : index
    %74 = vector.load %arg9[%c0_36, %c0_37] : memref<1x256xf32, #tpu.memory_space<vmem>>, vector<1x256xf32>
    %75 = vector.broadcast %74 : vector<1x256xf32> to vector<128x256xf32>
    %76 = arith.addf %73, %75 : vector<128x256xf32>
    %cst_38 = arith.constant 0.000000e+00 : f32
    %77 = vector.broadcast %cst_38 : f32 to vector<128x256xf32>
    %78 = arith.maximumf %76, %77 : vector<128x256xf32>
    %79 = arith.truncf %78 : vector<128x256xf32> to vector<128x256xbf16>
    %c0_39 = arith.constant 0 : index
    %c0_40 = arith.constant 0 : index
    %80 = vector.load %arg10[%c0_39, %c0_40] : memref<256x128xbf16, #tpu.memory_space<vmem>>, vector<256x128xbf16>
    %cst_41 = arith.constant dense<0.000000e+00> : vector<128x128xf32>
    %81 = tpu.matmul %79, %80, %cst_41 {dimension_numbers = #tpu.dot_dimension_numbers<[1], [0], [0], [1], [0, 0, 1, 1], [], []>} : vector<128x256xbf16>, vector<256x128xbf16>, vector<128x128xf32> -> vector<128x128xf32>
    %c0_42 = arith.constant 0 : index
    %c0_43 = arith.constant 0 : index
    %82 = vector.load %arg11[%c0_42, %c0_43] : memref<1x128xf32, #tpu.memory_space<vmem>>, vector<1x128xf32>
    %83 = vector.broadcast %82 : vector<1x128xf32> to vector<128x128xf32>
    %84 = arith.addf %81, %83 : vector<128x128xf32>
    %c0_44 = arith.constant 0 : index
    %c0_45 = arith.constant 0 : index
    %85 = vector.load %arg12[%c0_44, %c0_45] : memref<128x128xf32, #tpu.memory_space<vmem>>, vector<128x128xf32>
    tpu.vector_store %arg12[%c0_44, %c0_45], %84 {strides = array<i32>} : memref<128x128xf32, #tpu.memory_space<vmem>>, vector<128x128xf32>,
    return
  }
}

</mosaic_0001>

<bundles_post_ra>
// kernel: mlp_forward_padded.1
= control target key start
LH: loop header
LB: loop body
LE: loop exit
PB: predicated region body
PF: predicated region fallthrough
CT: control target
= control target key end

     0   :  { %17 = vsyncpa [#allocation3], 0  ;;  %s4231_s0 = inlined_call_operand.hbm [shape: f32[128,256], index: 0, kind: input, shape index: {}]   ;;  %s4232_s1 = inlined_call_operand.hbm [shape: bf16[256,256], index: 1, kind: input, shape index: {}]   ;;  %s4233_s2 = inlined_call_operand.vmem [shape: f32[1,256], index: 2, kind: input, shape index: {}]   ;;  %s4234_s3 = inlined_call_operand.hbm [shape: f32[1,256], index: 3, kind: input, shape index: {}]   ;;  %s4235_s4 = inlined_call_operand.hbm [shape: bf16[256,256], index: 4, kind: input, shape index: {}]   ;;  %s4236_s5 = inlined_call_operand.vmem [shape: f32[1,256], index: 5, kind: input, shape index: {}]   ;;  %s4237_s6 = inlined_call_operand.hbm [shape: f32[1,256], index: 6, kind: input, shape index: {}]   ;;  %s4238_s7 = inlined_call_operand.hbm [shape: bf16[256,256], index: 7, kind: input, shape index: {}]   ;;  %s4239_s8 = inlined_call_operand.vmem [shape: f32[1,256], index: 8, kind: input, shape index: {}]   ;;  %s4240_s9 = inlined_call_operand.hbm [shape: f32[1,256], index: 9, kind: input, shape index: {}]   ;;  %s4241_s10 = inlined_call_operand.hbm [shape: bf16[256,128], index: 10, kind: input, shape index: {}]   ;;  %s4242_s11 = inlined_call_operand.vmem [shape: f32[1,128], index: 11, kind: input, shape index: {}]   ;;  %s4243_s12 = inlined_call_operand.hbm [shape: f32[128,128], index: 12, kind: output, shape index: {}]  }
   0x1   :  { %18 = vsyncpa [#allocation6], 0 }
   0x2   :  { %19 = vsyncpa [#allocation9], 0 }
   0x3   :  { %20 = vsyncpa [#allocation12], 0 }
   0x4   :  { %21 = vsyncpa [#allocation15], 0 }
   0x5   :  { %22 = vsyncpa [#allocation4], 0  ;;  %s2869_s21 = smov [#allocation5]  }
   0x6   :  { %s40_s22 = sshll.u32 %s2869_s21, 4  ;;  %s41_s22 = int_to_ptr.vmem [resolvable:$true] %s40_s22 }
   0x7   :  { %s2685_s23 = scalar_lea.vmem %s41_s22, 4096  ;;  %p2690_p1 = scmp.lt.s32.totalorder %s41_s22, %s41_s22 }
   0x8   :  { %p2686_p0 = scmp.ne.s32.totalorder %s41_s22, %s2685_s23  ;;  %p2691_p2 = scmp.lt.s32.totalorder %s2685_s23, %s2685_s23 }
   0xa   :  { %p2692_p3 = por %p2691_p2, %p2690_p1 }
   0xc   :  { %p2693_p4 = pnand %p2692_p3, %p2686_p0 }
   0xe   :  { %2696 = shalt.err (!%p2693_p4)
}
   0xf   :  { %s2870_s24 = smov 128   ;;  %s2871_s25 = smov 8  }
  0x10   :  { %46 = dma.hbm_to_vmem [thread:$0]  %s4232_s1, 4096, %s41_s22, [#allocation6], %s2870_s24, %s2870_s24, %s2871_s25  }
  0x11   :  { %s2872_s28 = smov [#allocation8]   ;;  %s2873_s30 = smov [#allocation11]  }
  0x12   :  { %s64_s29 = sshll.u32 %s2872_s28, 4  ;;  %s88_s13 = sshll.u32 %s2873_s30, 4  ;;  %s65_s29 = int_to_ptr.vmem [resolvable:$true] %s64_s29  ;;  %s89_s13 = int_to_ptr.vmem [resolvable:$true] %s88_s13 }
  0x13   :  { %s2705_s14 = scalar_lea.vmem %s65_s29, 4096  ;;  %p2710_p6 = scmp.lt.s32.totalorder %s65_s29, %s65_s29 }
  0x14   :  { %p2706_p5 = scmp.ne.s32.totalorder %s65_s29, %s2705_s14  ;;  %p2711_p7 = scmp.lt.s32.totalorder %s2705_s14, %s2705_s14 }
  0x16   :  { %p2712_p8 = por %p2711_p7, %p2710_p6 }
  0x18   :  { %p2713_p9 = pnand %p2712_p8, %p2706_p5 }
  0x1a   :  { %2716 = shalt.err (!%p2713_p9)
}
  0x1b   :  { %70 = dma.hbm_to_vmem [thread:$0]  %s4235_s4, 4096, %s65_s29, [#allocation9], %s2870_s24, %s2870_s24, %s2871_s25  }
  0x1c   :  { %s2725_s1 = scalar_lea.vmem %s89_s13, 4096  ;;  %p2730_p11 = scmp.lt.s32.totalorder %s89_s13, %s89_s13 }
  0x1d   :  { %p2726_p10 = scmp.ne.s32.totalorder %s89_s13, %s2725_s1  ;;  %p2731_p12 = scmp.lt.s32.totalorder %s2725_s1, %s2725_s1 }
  0x1f   :  { %p2732_p13 = por %p2731_p12, %p2730_p11 }
  0x21   :  { %p2733_p0 = pnand %p2732_p13, %p2726_p10 }
  0x23   :  { %2736 = shalt.err (!%p2733_p0)
}
  0x24   :  { %94 = dma.hbm_to_vmem [thread:$0]  %s4238_s7, 4096, %s89_s13, [#allocation12], %s2870_s24, %s2870_s24, %s2871_s25  }
  0x25   :  { %s2874_s19 = smov [#allocation2]  }
  0x26   :  { %s28_s20 = sshll.u32 %s2874_s19, 4  ;;  %s29_s20 = int_to_ptr.vmem [resolvable:$true] %s28_s20 }
  0x27   :  { %s2745_s21 = scalar_lea.vmem %s29_s20, 4096  ;;  %p2750_p2 = scmp.lt.s32.totalorder %s29_s20, %s29_s20 }
  0x28   :  { %p2746_p1 = scmp.ne.s32.totalorder %s29_s20, %s2745_s21  ;;  %p2751_p3 = scmp.lt.s32.totalorder %s2745_s21, %s2745_s21 }
  0x2a   :  { %p2752_p4 = por %p2751_p3, %p2750_p2 }
  0x2c   :  { %p2753_p5 = pnand %p2752_p4, %p2746_p1 }
  0x2e   :  { %2756 = shalt.err (!%p2753_p5)
}
  0x2f   :  { %s2875_s4 = smov 256   ;;  %s2876_s22 = smov 16  }
  0x30   :  { %34 = dma.hbm_to_vmem [thread:$0]  %s4231_s0, 4096, %s29_s20, [#allocation3], %s2875_s4, %s2875_s4, %s2876_s22  }
  0x31   :  { %s2877_s27 = smov [#allocation7]   ;;  %s2878_s29 = smov [#allocation10]  }
  0x32   :  { %s55_s28 = sshll.u32 %s2877_s27, 4  ;;  %s79_s7 = sshll.u32 %s2878_s29, 4  ;;  %s56_s28 = int_to_ptr.vmem [resolvable:$true] %s55_s28  ;;  %s80_s7 = int_to_ptr.vmem [resolvable:$true] %s79_s7 }
  0x33   :  { %s2765_s30 = scalar_lea.vmem %s56_s28, 32  ;;  %p2770_p7 = scmp.lt.s32.totalorder %s56_s28, %s56_s28 }
  0x34   :  { %p2766_p6 = scmp.ne.s32.totalorder %s56_s28, %s2765_s30  ;;  %p2771_p8 = scmp.lt.s32.totalorder %s2765_s30, %s2765_s30 }
  0x36   :  { %p2772_p9 = por %p2771_p8, %p2770_p7 }
  0x38   :  { %p2773_p10 = pnand %p2772_p9, %p2766_p6 }
  0x3a   :  { %2776 = shalt.err (!%p2773_p10)
}
  0x3b   :  { %58 = dma.hbm_to_vmem [thread:$0]  %s4234_s3, 32, %s56_s28, [#allocation6]  }
  0x3c   :  { %s2785_s15 = scalar_lea.vmem %s80_s7, 32  ;;  %p2790_p12 = scmp.lt.s32.totalorder %s80_s7, %s80_s7 }
  0x3d   :  { %p2786_p11 = scmp.ne.s32.totalorder %s80_s7, %s2785_s15  ;;  %p2791_p13 = scmp.lt.s32.totalorder %s2785_s15, %s2785_s15 }
  0x3f   :  { %p2792_p0 = por %p2791_p13, %p2790_p12 }
  0x41   :  { %p2793_p1 = pnand %p2792_p0, %p2786_p11 }
  0x43   :  { %2796 = shalt.err (!%p2793_p1)
}
  0x44   :  { %82 = dma.hbm_to_vmem [thread:$0]  %s4237_s6, 32, %s80_s7, [#allocation9]  }
  0x45   :  { %s2879_s1 = smov [#allocation13]   ;;  %s2880_s18 = smov [#allocation14]  }
  0x46   :  { %s103_s17 = sshll.u32 %s2879_s1, 4  ;;  %s112_s19 = sshll.u32 %s2880_s18, 4  ;;  %s104_s17 = int_to_ptr.vmem [resolvable:$true] %s103_s17  ;;  %s113_s19 = int_to_ptr.vmem [resolvable:$true] %s112_s19 }
  0x47   :  { %s2805_s20 = scalar_lea.vmem %s104_s17, 32  ;;  %p2810_p3 = scmp.lt.s32.totalorder %s104_s17, %s104_s17 }
  0x48   :  { %p2806_p2 = scmp.ne.s32.totalorder %s104_s17, %s2805_s20  ;;  %p2811_p4 = scmp.lt.s32.totalorder %s2805_s20, %s2805_s20 }
  0x4a   :  { %p2812_p5 = por %p2811_p4, %p2810_p3 }
  0x4c   :  { %p2813_p6 = pnand %p2812_p5, %p2806_p2 }
  0x4e   :  { %2816 = shalt.err (!%p2813_p6)
}
  0x4f   :  { %106 = dma.hbm_to_vmem [thread:$0]  %s4240_s9, 32, %s104_s17, [#allocation12]  }
  0x50   :  { %s2825_s4 = scalar_lea.vmem %s113_s19, 2048  ;;  %p2830_p8 = scmp.lt.s32.totalorder %s113_s19, %s113_s19 }
  0x51   :  { %p2826_p7 = scmp.ne.s32.totalorder %s113_s19, %s2825_s4  ;;  %p2831_p9 = scmp.lt.s32.totalorder %s2825_s4, %s2825_s4 }
  0x53   :  { %p2832_p10 = por %p2831_p9, %p2830_p8 }
  0x55   :  { %p2833_p11 = pnand %p2832_p10, %p2826_p7 }
  0x57   :  { %2836 = shalt.err (!%p2833_p11)
}
  0x58   :  { %s2881_s6 = smov 64   ;;  %s2882_s22 = smov 4  }
  0x59   :  { %118 = dma.hbm_to_vmem [thread:$0]  %s4241_s10, 2048, %s113_s19, [#allocation15], %s2881_s6, %s2881_s6, %s2882_s22  }
  0x5a   :  { %2857 = dma.done.wait [#allocation3], 4096  }
  0x5b   :  { %2858 = vsyncadd [#allocation3], 4294963200 }
  0x5c   :  { %2859 = dma.done.wait [#allocation6], 4128  }
  0x5d   :  { %2860 = vsyncadd [#allocation6], 4294963168 }
  0x5e   :  { %2861 = dma.done.wait [#allocation9], 4128  }
  0x5f   :  { %2862 = vsyncadd [#allocation9], 4294963168 }
  0x60   :  { %2863 = dma.done.wait [#allocation12], 4128  }
  0x61   :  { %2864 = vsyncadd [#allocation12], 4294963168 }
  0x62   :  { %2865 = dma.done.wait [#allocation15], 2048  }
  0x63   :  { %2866 = vsyncadd [#allocation15], 4294965248  ;;  %v2505_v0 = vld [vmem:[#allocation5 + $0x74] ss:$8 sps:$4 sm:$0xff]   ;;  %v2507_v1 = vld [vmem:[#allocation5 + $0x70] ss:$8 sps:$4 sm:$0xff]  }
  0x64   :  { %386 = vmatprep.subr.bf16.mxu0 %v2505_v0  ;;  %v2508_v2 = vld [vmem:[#allocation5 + $0x64] ss:$8 sps:$4 sm:$0xff]   ;;  %v2510_v3 = vld [vmem:[#allocation5 + $0x60] ss:$8 sps:$4 sm:$0xff]   ;;  %v2511_v4 = vld [vmem:[#allocation5 + $0x54] ss:$8 sps:$4 sm:$0xff]  }
  0x65   :  { %387 = vmatpush1.bf16.msra.mxu0 %v2507_v1  ;;  %v2513_v5 = vld [vmem:[#allocation5 + $0x50] ss:$8 sps:$4 sm:$0xff]   ;;  %v2514_v6 = vld [vmem:[#allocation5 + $0x44] ss:$8 sps:$4 sm:$0xff]   ;;  %v2516_v7 = vld [vmem:[#allocation5 + $0x40] ss:$8 sps:$4 sm:$0xff]  }
  0x66   :  { %388 = vmatprep.subr.bf16.mxu0 %v2508_v2  ;;  %v2517_v8 = vld [vmem:[#allocation5 + $0x34] ss:$8 sps:$4 sm:$0xff]   ;;  %v2519_v9 = vld [vmem:[#allocation5 + $0x30] ss:$8 sps:$4 sm:$0xff]   ;;  %v2520_v10 = vld [vmem:[#allocation5 + $0x24] ss:$8 sps:$4 sm:$0xff]  }
  0x67   :  { %v2522_v11 = vld [vmem:[#allocation5 + $0x20] ss:$8 sps:$4 sm:$0xff]   ;;  %v2523_v12 = vld [vmem:[#allocation5 + $0x14] ss:$8 sps:$4 sm:$0xff]   ;;  %v2525_v16 = vld [vmem:[#allocation5 + $0x10] ss:$8 sps:$4 sm:$0xff]  }
  0x68   :  { %v147_v13 = vld [vmem:[#allocation2 + $0x8] sm:$0xff]  ;;  %v149_v14 = vld [vmem:[#allocation2 + $0x18] sm:$0xff]  ;;  %v146_v35 = vld [vmem:[#allocation2] sm:$0xff] }
  0x69   :  { %389 = vmatpush1.bf16.msra.mxu0 %v2510_v3  ;;  %v179_v15 = vpack.c.bf16 %v149_v14, %v147_v13  ;;  %v2526_v17 = vld [vmem:[#allocation5 + $0x4] ss:$8 sps:$4 sm:$0xff]   ;;  %v2528_v18 = vld [vmem:[#allocation5] ss:$8 sps:$4 sm:$0xff]   ;;  %v2529_v19 = vld [vmem:[#allocation5 + $0xf4] ss:$8 sps:$4 sm:$0xff]  }
  0x6a   :  { %390 = vmatprep.subr.bf16.mxu0 %v2511_v4  ;;  %v2531_v20 = vld [vmem:[#allocation5 + $0xf0] ss:$8 sps:$4 sm:$0xff]   ;;  %v2532_v21 = vld [vmem:[#allocation5 + $0xe4] ss:$8 sps:$4 sm:$0xff]   ;;  %v2534_v22 = vld [vmem:[#allocation5 + $0xe0] ss:$8 sps:$4 sm:$0xff]  }
  0x6b   :  { %418 = vmatprep.mubr.bf16.mxu0 %v179_v15  ;;  %v2535_v23 = vld [vmem:[#allocation5 + $0xd4] ss:$8 sps:$4 sm:$0xff]   ;;  %v2537_v24 = vld [vmem:[#allocation5 + $0xd0] ss:$8 sps:$4 sm:$0xff]   ;;  %v2538_v25 = vld [vmem:[#allocation5 + $0xc4] ss:$8 sps:$4 sm:$0xff]  }
  0x6c   :  { %v2540_v26 = vld [vmem:[#allocation5 + $0xc0] ss:$8 sps:$4 sm:$0xff]   ;;  %v2541_v27 = vld [vmem:[#allocation5 + $0xb4] ss:$8 sps:$4 sm:$0xff]   ;;  %v2543_v28 = vld [vmem:[#allocation5 + $0xb0] ss:$8 sps:$4 sm:$0xff]  }
  0x6d   :  { %391 = vmatpush1.bf16.msra.mxu0 %v2513_v5  ;;  %v2544_v29 = vld [vmem:[#allocation5 + $0xa4] ss:$8 sps:$4 sm:$0xff]   ;;  %v2546_v30 = vld [vmem:[#allocation5 + $0xa0] ss:$8 sps:$4 sm:$0xff]   ;;  %v2547_v31 = vld [vmem:[#allocation5 + $0x94] ss:$8 sps:$4 sm:$0xff]  }
  0x6e   :  { %392 = vmatprep.subr.bf16.mxu0 %v2514_v6  ;;  %v2549_v32 = vld [vmem:[#allocation5 + $0x90] ss:$8 sps:$4 sm:$0xff]   ;;  %v2550_v33 = vld [vmem:[#allocation5 + $0x84] ss:$8 sps:$4 sm:$0xff]   ;;  %v2552_v34 = vld [vmem:[#allocation5 + $0x80] ss:$8 sps:$4 sm:$0xff]  }
  0x6f   :  { %v148_v36 = vld [vmem:[#allocation2 + $0x10] sm:$0xff]  ;;  %v151_v37 = vld [vmem:[#allocation2 + $0x28] sm:$0xff]  ;;  %v153_v38 = vld [vmem:[#allocation2 + $0x38] sm:$0xff] }
  0x70   :  { %v178_v39 = vpack.c.bf16 %v148_v36, %v146_v35  ;;  %v181_v40 = vpack.c.bf16 %v153_v38, %v151_v37  ;;  %v150_v41 = vld [vmem:[#allocation2 + $0x20] sm:$0xff]  ;;  %v152_v42 = vld [vmem:[#allocation2 + $0x30] sm:$0xff]  ;;  %v155_v43 = vld [vmem:[#allocation2 + $0x48] sm:$0xff] }
  0x71   :  { %393 = vmatpush1.bf16.msra.mxu0 %v2516_v7  ;;  %v157_v44 = vld [vmem:[#allocation2 + $0x58] sm:$0xff]  ;;  %v180_v45 = vpack.c.bf16 %v152_v42, %v150_v41  ;;  %v154_v47 = vld [vmem:[#allocation2 + $0x40] sm:$0xff]  ;;  %v156_v48 = vld [vmem:[#allocation2 + $0x50] sm:$0xff] }
  0x72   :  { %394 = vmatprep.subr.bf16.mxu0 %v2517_v8  ;;  %v183_v46 = vpack.c.bf16 %v157_v44, %v155_v43  ;;  %v159_v49 = vld [vmem:[#allocation2 + $0x68] sm:$0xff]  ;;  %v161_v50 = vld [vmem:[#allocation2 + $0x78] sm:$0xff]  ;;  %v182_v51 = vpack.c.bf16 %v156_v48, %v154_v47  ;;  %v158_v53 = vld [vmem:[#allocation2 + $0x60] sm:$0xff] }
  0x73   :  { %v185_v52 = vpack.c.bf16 %v161_v50, %v159_v49  ;;  %v160_v54 = vld [vmem:[#allocation2 + $0x70] sm:$0xff]  ;;  %v163_v55 = vld [vmem:[#allocation2 + $0x88] sm:$0xff]  ;;  %v165_v56 = vld [vmem:[#allocation2 + $0x98] sm:$0xff] }
  0x74   :  { %v184_v57 = vpack.c.bf16 %v160_v54, %v158_v53  ;;  %v187_v58 = vpack.c.bf16 %v165_v56, %v163_v55  ;;  %v162_v59 = vld [vmem:[#allocation2 + $0x80] sm:$0xff]  ;;  %v164_v60 = vld [vmem:[#allocation2 + $0x90] sm:$0xff]  ;;  %v167_v61 = vld [vmem:[#allocation2 + $0xa8] sm:$0xff] }
  0x75   :  { %395 = vmatpush1.bf16.msra.mxu0 %v2519_v9  ;;  %v169_v62 = vld [vmem:[#allocation2 + $0xb8] sm:$0xff]  ;;  %v186_v63 = vpack.c.bf16 %v164_v60, %v162_v59  ;;  %v166_v1 = vld [vmem:[#allocation2 + $0xa0] sm:$0xff]  ;;  %v168_v2 = vld [vmem:[#allocation2 + $0xb0] sm:$0xff] }
  0x76   :  { %396 = vmatprep.subr.bf16.mxu0 %v2520_v10  ;;  %v189_v0 = vpack.c.bf16 %v169_v62, %v167_v61  ;;  %v171_v3 = vld [vmem:[#allocation2 + $0xc8] sm:$0xff]  ;;  %v173_v4 = vld [vmem:[#allocation2 + $0xd8] sm:$0xff]  ;;  %v188_v5 = vpack.c.bf16 %v168_v2, %v166_v1  ;;  %v170_v7 = vld [vmem:[#allocation2 + $0xc0] sm:$0xff] }
  0x77   :  { %v191_v6 = vpack.c.bf16 %v173_v4, %v171_v3  ;;  %v172_v8 = vld [vmem:[#allocation2 + $0xd0] sm:$0xff]  ;;  %v175_v9 = vld [vmem:[#allocation2 + $0xe8] sm:$0xff]  ;;  %v177_v10 = vld [vmem:[#allocation2 + $0xf8] sm:$0xff] }
  0x78   :  { %v174_v13 = vld [vmem:[#allocation2 + $0xe0] sm:$0xff]  ;;  %v176_v14 = vld [vmem:[#allocation2 + $0xf0] sm:$0xff] }
  0x79   :  { %397 = vmatpush1.bf16.msra.mxu0 %v2522_v11  ;;  %v190_v11 = vpack.c.bf16 %v172_v8, %v170_v7  ;;  %v192_v15 = vpack.c.bf16 %v176_v14, %v174_v13  ;;  %v2574_v36 = vld [vmem:[#allocation8 + $0x4] ss:$8 sps:$4 sm:$0xff]   ;;  %v2576_v38 = vld [vmem:[#allocation8] ss:$8 sps:$4 sm:$0xff]   ;;  %v2579_v42 = vld [vmem:[#allocation8 + $0xf0] ss:$8 sps:$4 sm:$0xff]  }
  0x7a   :  { %398 = vmatprep.subr.bf16.mxu0 %v2523_v12  ;;  %v193_v12 = vpack.c.bf16 %v177_v10, %v175_v9  ;;  %v2580_v44 = vld [vmem:[#allocation8 + $0xe4] ss:$8 sps:$4 sm:$0xff]   ;;  %v2583_v48 = vld [vmem:[#allocation8 + $0xd4] ss:$8 sps:$4 sm:$0xff]   ;;  %v2585_v50 = vld [vmem:[#allocation8 + $0xd0] ss:$8 sps:$4 sm:$0xff]  }
  0x7b   :  { %v2588_v54 = vld [vmem:[#allocation8 + $0xc0] ss:$8 sps:$4 sm:$0xff]   ;;  %v2589_v56 = vld [vmem:[#allocation8 + $0xb4] ss:$8 sps:$4 sm:$0xff]   ;;  %v2597_v9 = vld [vmem:[#allocation8 + $0x90] ss:$8 sps:$4 sm:$0xff]  }
  0x7c   :  { %v2594_v1 = vld [vmem:[#allocation8 + $0xa0] ss:$8 sps:$4 sm:$0xff]   ;;  %v2595_v7 = vld [vmem:[#allocation8 + $0x94] ss:$8 sps:$4 sm:$0xff]  }
  0x7d   :  { %399 = vmatpush1.bf16.msra.mxu0 %v2525_v16  ;;  %v2553_v16 = vld [vmem:[#allocation8 + $0x74] ss:$8 sps:$4 sm:$0xff]   ;;  %v2600_v14 = vld [vmem:[#allocation8 + $0x80] ss:$8 sps:$4 sm:$0xff]  }
  0x7e   :  { %400 = vmatprep.subr.bf16.mxu0 %v2526_v17  ;;  %v2555_v17 = vld [vmem:[#allocation8 + $0x70] ss:$8 sps:$4 sm:$0xff]   ;;  %1003 = vmatprep.subr.bf16.mxu1 %v2553_v16 }
  0x7f   :  { %1004 = vmatpush1.bf16.msra.mxu1 %v2555_v17 }
  0x81   :  { %401 = vmatpush1.bf16.msra.mxu0 %v2528_v18  ;;  %v2556_v18 = vld [vmem:[#allocation8 + $0x64] ss:$8 sps:$4 sm:$0xff]  }
  0x82   :  { %402 = vmatprep.subr.bf16.mxu0 %v2529_v19  ;;  %v2558_v19 = vld [vmem:[#allocation8 + $0x60] ss:$8 sps:$4 sm:$0xff]   ;;  %1005 = vmatprep.subr.bf16.mxu1 %v2556_v18 }
  0x83   :  { %1006 = vmatpush1.bf16.msra.mxu1 %v2558_v19 }
  0x85   :  { %403 = vmatpush2.bf16.msra.mxu0 %v2531_v20  ;;  %v2559_v20 = vld [vmem:[#allocation8 + $0x54] ss:$8 sps:$4 sm:$0xff]  }
  0x86   :  { %404 = vmatprep.subr.bf16.mxu0 %v2532_v21  ;;  %v2561_v21 = vld [vmem:[#allocation8 + $0x50] ss:$8 sps:$4 sm:$0xff]   ;;  %1007 = vmatprep.subr.bf16.mxu1 %v2559_v20 }
  0x87   :  { %1008 = vmatpush1.bf16.msra.mxu1 %v2561_v21 }
  0x89   :  { %405 = vmatpush2.bf16.msra.mxu0 %v2534_v22  ;;  %v2562_v22 = vld [vmem:[#allocation8 + $0x44] ss:$8 sps:$4 sm:$0xff]  }
  0x8a   :  { %406 = vmatprep.subr.bf16.mxu0 %v2535_v23  ;;  %v2564_v23 = vld [vmem:[#allocation8 + $0x40] ss:$8 sps:$4 sm:$0xff]   ;;  %1009 = vmatprep.subr.bf16.mxu1 %v2562_v22 }
  0x8b   :  { %1010 = vmatpush1.bf16.msra.mxu1 %v2564_v23 }
  0x8d   :  { %407 = vmatpush2.bf16.msra.mxu0 %v2537_v24  ;;  %v2565_v24 = vld [vmem:[#allocation8 + $0x34] ss:$8 sps:$4 sm:$0xff]  }
  0x8e   :  { %408 = vmatprep.subr.bf16.mxu0 %v2538_v25  ;;  %1011 = vmatprep.subr.bf16.mxu1 %v2565_v24 }
  0x91   :  { %409 = vmatpush2.bf16.msra.mxu0 %v2540_v26  ;;  %v2567_v26 = vld [vmem:[#allocation8 + $0x30] ss:$8 sps:$4 sm:$0xff]  }
  0x92   :  { %410 = vmatprep.subr.bf16.mxu0 %v2541_v27  ;;  %1012 = vmatpush1.bf16.msra.mxu1 %v2567_v26 }
  0x95   :  { %411 = vmatpush2.bf16.msra.mxu0 %v2543_v28  ;;  %v2568_v28 = vld [vmem:[#allocation8 + $0x24] ss:$8 sps:$4 sm:$0xff]  }
  0x96   :  { %412 = vmatprep.subr.bf16.mxu0 %v2544_v29  ;;  %1013 = vmatprep.subr.bf16.mxu1 %v2568_v28 }
  0x99   :  { %413 = vmatpush2.bf16.msra.mxu0 %v2546_v30  ;;  %v2570_v30 = vld [vmem:[#allocation8 + $0x20] ss:$8 sps:$4 sm:$0xff]  }
  0x9a   :  { %414 = vmatprep.subr.bf16.mxu0 %v2547_v31  ;;  %1014 = vmatpush1.bf16.msra.mxu1 %v2570_v30 }
  0x9d   :  { %415 = vmatpush2.bf16.msra.mxu0 %v2549_v32  ;;  %v2571_v32 = vld [vmem:[#allocation8 + $0x14] ss:$8 sps:$4 sm:$0xff]  }
  0x9e   :  { %416 = vmatprep.subr.bf16.mxu0 %v2550_v33  ;;  %1015 = vmatprep.subr.bf16.mxu1 %v2571_v32 }
  0xa1   :  { %417 = vmatpush2.bf16.msra.mxu0 %v2552_v34  ;;  %v2573_v34 = vld [vmem:[#allocation8 + $0x10] ss:$8 sps:$4 sm:$0xff]  }
  0xa2   :  { %1016 = vmatpush1.bf16.msra.mxu1 %v2573_v34 }
  0xa3   :  { %1017 = vmatprep.subr.bf16.mxu1 %v2574_v36 }
  0xa4   :  { %419 = vmatmul.mubr.bf16.vlgmr.msra.gmra.mxu0 %v178_v39 }
  0xa5   :  { %428 = vmatprep.mubr.bf16.mxu0 %v181_v40  ;;  %v2577_v40 = vld [vmem:[#allocation8 + $0xf4] ss:$8 sps:$4 sm:$0xff]  }
  0xa6   :  { %1018 = vmatpush1.bf16.msra.mxu1 %v2576_v38 }
  0xa7   :  { %1019 = vmatprep.subr.bf16.mxu1 %v2577_v40 }
  0xaa   :  { %1020 = vmatpush2.bf16.msra.mxu1 %v2579_v42 }
  0xab   :  { %1021 = vmatprep.subr.bf16.mxu1 %v2580_v44 }
  0xac   :  { %429 = vmatmul.mubr.bf16.gmra.mxu0 %v180_v45 }
  0xad   :  { %438 = vmatprep.mubr.bf16.mxu0 %v183_v46  ;;  %v2582_v46 = vld [vmem:[#allocation8 + $0xe0] ss:$8 sps:$4 sm:$0xff]  }
  0xae   :  { %1022 = vmatpush2.bf16.msra.mxu1 %v2582_v46 }
  0xaf   :  { %1023 = vmatprep.subr.bf16.mxu1 %v2583_v48 }
  0xb2   :  { %1024 = vmatpush2.bf16.msra.mxu1 %v2585_v50 }
  0xb4   :  { %439 = vmatmul.mubr.bf16.gmra.mxu0 %v182_v51 }
  0xb5   :  { %448 = vmatprep.mubr.bf16.mxu0 %v185_v52  ;;  %v2586_v52 = vld [vmem:[#allocation8 + $0xc4] ss:$8 sps:$4 sm:$0xff]  }
  0xb6   :  { %1025 = vmatprep.subr.bf16.mxu1 %v2586_v52 }
  0xb7   :  { %1026 = vmatpush2.bf16.msra.mxu1 %v2588_v54 }
  0xb8   :  { %1027 = vmatprep.subr.bf16.mxu1 %v2589_v56 }
  0xbc   :  { %449 = vmatmul.mubr.bf16.gmra.mxu0 %v184_v57 }
  0xbd   :  { %458 = vmatprep.mubr.bf16.mxu0 %v187_v58  ;;  %v2591_v58 = vld [vmem:[#allocation8 + $0xb0] ss:$8 sps:$4 sm:$0xff]  }
  0xbe   :  { %1028 = vmatpush2.bf16.msra.mxu1 %v2591_v58 }
  0xc4   :  { %459 = vmatmul.mubr.bf16.gmra.mxu0 %v186_v63  ;;  %v2592_v63 = vld [vmem:[#allocation8 + $0xa4] ss:$8 sps:$4 sm:$0xff]  }
  0xc5   :  { %468 = vmatprep.mubr.bf16.mxu0 %v189_v0  ;;  %1029 = vmatprep.subr.bf16.mxu1 %v2592_v63 }
  0xc6   :  { %1030 = vmatpush2.bf16.msra.mxu1 %v2594_v1 }
  0xc7   :  { %1031 = vmatprep.subr.bf16.mxu1 %v2595_v7 }
  0xca   :  { %1032 = vmatpush2.bf16.msra.mxu1 %v2597_v9 }
  0xcc   :  { %469 = vmatmul.mubr.bf16.gmra.mxu0 %v188_v5 }
  0xcd   :  { %478 = vmatprep.mubr.bf16.mxu0 %v191_v6 }
  0xd4   :  { %479 = vmatmul.mubr.bf16.gmra.mxu0 %v190_v11 }
  0xd5   :  { %488 = vmatprep.mubr.bf16.mxu0 %v193_v12  ;;  %v2598_v12 = vld [vmem:[#allocation8 + $0x84] ss:$8 sps:$4 sm:$0xff]  }
  0xd6   :  { %1033 = vmatprep.subr.bf16.mxu1 %v2598_v12 }
  0xd7   :  { %1034 = vmatpush2.bf16.msra.mxu1 %v2600_v14 }
  0xdc   :  { %489 = vmatmul.mubr.bf16.gmra.mxu0 %v192_v15 }
 0x164   :  { %v2983_v25 = vpop.f32.mrf.mxu0 }
 0x166   :  { %v2985_v27 = vpop.f32.mrf.mxu0 }
 0x168   :  { %v2987_v29 = vpop.f32.mrf.mxu0 }
 0x169   :  { %v499_v59 = vadd.f32 %v2987_v29, %v2983_v25 }
 0x16a   :  { %v2989_v31 = vpop.f32.mrf.mxu0 }
 0x16b   :  { %v520_v61 = vadd.f32 %v2989_v31, %v2985_v27 }
 0x16c   :  { %v2991_v33 = vpop.f32.mrf.mxu0 }
 0x16d   :  { %v500_v62 = vadd.f32 %v499_v59, %v2991_v33 }
 0x16e   :  { %v2993_v35 = vpop.f32.mrf.mxu0 }
 0x16f   :  { %v521_v2 = vadd.f32 %v520_v61, %v2993_v35 }
 0x170   :  { %v2995_v37 = vpop.f32.mrf.mxu0 }
 0x171   :  { %v501_v3 = vadd.f32 %v500_v62, %v2995_v37 }
 0x172   :  { %v2997_v39 = vpop.f32.mrf.mxu0 }
 0x173   :  { %v522_v5 = vadd.f32 %v521_v2, %v2997_v39 }
 0x174   :  { %v2999_v41 = vpop.f32.mrf.mxu0 }
 0x175   :  { %v502_v6 = vadd.f32 %v501_v3, %v2999_v41 }
 0x176   :  { %v3001_v43 = vpop.f32.mrf.mxu0 }
 0x177   :  { %v523_v10 = vadd.f32 %v522_v5, %v3001_v43 }
 0x178   :  { %v3003_v45 = vpop.f32.mrf.mxu0 }
 0x179   :  { %v503_v11 = vadd.f32 %v502_v6, %v3003_v45 }
 0x17a   :  { %v3005_v47 = vpop.f32.mrf.mxu0 }
 0x17b   :  { %v524_v15 = vadd.f32 %v523_v10, %v3005_v47 }
 0x17c   :  { %v3007_v49 = vpop.f32.mrf.mxu0 }
 0x17d   :  { %v504_v16 = vadd.f32 %v503_v11, %v3007_v49 }
 0x17e   :  { %v3009_v51 = vpop.f32.mrf.mxu0 }
 0x17f   :  { %v525_v18 = vadd.f32 %v524_v15, %v3009_v51 }
 0x180   :  { %v3011_v53 = vpop.f32.mrf.mxu0 }
 0x181   :  { %v505_v19 = vadd.f32 %v504_v16, %v3011_v53 }
 0x182   :  { %v3013_v55 = vpop.f32.mrf.mxu0 }
 0x183   :  { %v526_v21 = vadd.f32 %v525_v18, %v3013_v55 }
 0x184   :  { %v3015_v57 = vpop.f32.mrf.mxu0 }
 0x185   :  { %v506_v22 = vadd.f32 %v505_v19, %v3015_v57 }
 0x186   :  { %v3019_v60 = vpop.f32.mrf.mxu0 }
 0x187   :  { %v527_v24 = vadd.f32 %v526_v21, %v3019_v60 }
 0x188   :  { %v3024_v0 = vpop.f32.mrf.mxu0 }
 0x189   :  { %v507_v26 = vadd.f32 %v506_v22, %v3024_v0 }
 0x18a   :  { %v3028_v4 = vpop.f32.mrf.mxu0 }
 0x18b   :  { %v528_v30 = vadd.f32 %v527_v24, %v3028_v4 }
 0x18c   :  { %v3032_v8 = vpop.f32.mrf.mxu0 }
 0x18d   :  { %v508_v32 = vadd.f32 %v507_v26, %v3032_v8 }
 0x18e   :  { %v3036_v13 = vpop.f32.mrf.mxu0 }
 0x18f   :  { %v529_v36 = vadd.f32 %v528_v30, %v3036_v13 }
 0x190   :  { %v3040_v17 = vpop.f32.mrf.mxu0 }
 0x191   :  { %v509_v38 = vadd.f32 %v508_v32, %v3040_v17 }
 0x192   :  { %v3044_v20 = vpop.f32.mrf.mxu0 }
 0x193   :  { %v530_v42 = vadd.f32 %v529_v36, %v3044_v20 }
 0x194   :  { %v3048_v23 = vpop.f32.mrf.mxu0 }
 0x195   :  { %v510_v44 = vadd.f32 %v509_v38, %v3048_v23 }
 0x196   :  { %v3052_v28 = vpop.f32.mrf.mxu0 }
 0x197   :  { %v531_v48 = vadd.f32 %v530_v42, %v3052_v28 }
 0x198   :  { %v3056_v34 = vpop.f32.mrf.mxu0 }
 0x199   :  { %v511_v50 = vadd.f32 %v510_v44, %v3056_v34 }
 0x19a   :  { %v3060_v40 = vpop.f32.mrf.mxu0 }
 0x19b   :  { %v532_v54 = vadd.f32 %v531_v48, %v3060_v40 }
 0x19c   :  { %v3064_v46 = vpop.f32.mrf.mxu0 }
 0x19d   :  { %v512_v56 = vadd.f32 %v511_v50, %v3064_v46 }
 0x19e   :  { %v3068_v52 = vpop.f32.mrf.mxu0 }
 0x19f   :  { %v533_v59 = vadd.f32 %v532_v54, %v3068_v52 }
 0x1a0   :  { %v3072_v58 = vpop.f32.mrf.mxu0 }
 0x1a1   :  { %v513_v61 = vadd.f32 %v512_v56, %v3072_v58 }
 0x1a2   :  { %v3076_v62 = vpop.f32.mrf.mxu0 }
 0x1a3   :  { %v514_v63 = vrot.slane %v513_v61, 4  ;;  %v534_v1 = vadd.f32 %v533_v59, %v3076_v62 }
 0x1a5   :  { %v515_v2 = vadd.f32 %v514_v63, %v513_v61  ;;  %v535_v3 = vrot.slane %v534_v1, 4 }
 0x1a7   :  { %v516_v5 = vrot.slane %v515_v2, 2  ;;  %v536_v6 = vadd.f32 %v535_v3, %v534_v1 }
 0x1a9   :  { %v517_v7 = vadd.f32 %v516_v5, %v515_v2  ;;  %v537_v9 = vrot.slane %v536_v6, 2 }
 0x1ab   :  { %v518_v10 = vrot.slane %v517_v7, 1  ;;  %v538_v12 = vadd.f32 %v537_v9, %v536_v6 }
 0x1ad   :  { %v519_v11 = vadd.f32 %v518_v10, %v517_v7  ;;  %v539_v18 = vrot.slane %v538_v12, 1 }
 0x1af   :  { %v3079_v14 = vmul.f32 0.0078125, %v519_v11  ;;  %v540_v24 = vadd.f32 %v539_v18, %v538_v12 }
 0x1b1   :  { %v3083_v15 = vsub.f32 %v2983_v25, %v3079_v14  ;;  %v3087_v16 = vsub.f32 %v2987_v29, %v3079_v14  ;;  %v3091_v19 = vsub.f32 %v2991_v33, %v3079_v14  ;;  %v3099_v25 = vsub.f32 %v2995_v37, %v3079_v14 }
 0x1b2   :  { %v3103_v29 = vsub.f32 %v2999_v41, %v3079_v14  ;;  %v3107_v30 = vmul.f32 0.0078125, %v540_v24  ;;  %v3111_v32 = vsub.f32 %v3003_v45, %v3079_v14  ;;  %v3125_v42 = vsub.f32 %v3007_v49, %v3079_v14 }
 0x1b3   :  { %v576_v21 = vmul.f32 %v3083_v15, %v3083_v15  ;;  %v578_v22 = vmul.f32 %v3087_v16, %v3087_v16  ;;  %v580_v26 = vmul.f32 %v3091_v19, %v3091_v19  ;;  %v582_v36 = vmul.f32 %v3099_v25, %v3099_v25 }
 0x1b4   :  { %v3117_v37 = vsub.f32 %v2985_v27, %v3107_v30  ;;  %v3121_v41 = vsub.f32 %v2989_v31, %v3107_v30  ;;  %v584_v45 = vmul.f32 %v3103_v29, %v3103_v29  ;;  %v3131_v48 = vsub.f32 %v3011_v53, %v3079_v14 }
 0x1b5   :  { %v608_v33 = vadd.f32 %v578_v22, %v576_v21  ;;  %v586_v27 = vmul.f32 %v3111_v32, %v3111_v32  ;;  %v3137_v31 = vsub.f32 %v2993_v35, %v3107_v30  ;;  %v3145_v56 = vsub.f32 %v3015_v57, %v3079_v14 }
 0x1b6   :  { %v577_v49 = vmul.f32 %v3117_v37, %v3117_v37  ;;  %v579_v54 = vmul.f32 %v3121_v41, %v3121_v41  ;;  %v588_v53 = vmul.f32 %v3125_v42, %v3125_v42  ;;  %v3151_v61 = vsub.f32 %v2997_v39, %v3107_v30 }
 0x1b7   :  { %v609_v38 = vadd.f32 %v608_v33, %v580_v26  ;;  %v3155_v35 = vsub.f32 %v3024_v0, %v3079_v14  ;;  %v590_v63 = vmul.f32 %v3131_v48, %v3131_v48  ;;  %v3161_v57 = vsub.f32 %v3001_v43, %v3107_v30 }
 0x1b8   :  { %v581_v2 = vmul.f32 %v3137_v31, %v3137_v31  ;;  %v629_v3 = vadd.f32 %v579_v54, %v577_v49  ;;  %v3167_v39 = vsub.f32 %v3032_v8, %v3079_v14  ;;  %v592_v0 = vmul.f32 %v3145_v56, %v3145_v56 }
 0x1b9   :  { %v610_v44 = vadd.f32 %v609_v38, %v582_v36  ;;  %v3173_v6 = vsub.f32 %v3005_v47, %v3107_v30  ;;  %v583_v43 = vmul.f32 %v3151_v61, %v3151_v61  ;;  %v3179_v9 = vsub.f32 %v3040_v17, %v3079_v14 }
 0x1ba   :  { %v630_v7 = vadd.f32 %v629_v3, %v581_v2  ;;  %v594_v8 = vmul.f32 %v3155_v35, %v3155_v35  ;;  %v3185_v11 = vsub.f32 %v3009_v51, %v3107_v30  ;;  %v585_v47 = vmul.f32 %v3161_v57, %v3161_v57 }
 0x1bb   :  { %v611_v50 = vadd.f32 %v610_v44, %v584_v45  ;;  %v3191_v18 = vsub.f32 %v3048_v23, %v3079_v14  ;;  %v596_v17 = vmul.f32 %v3167_v39, %v3167_v39  ;;  %v3197_v22 = vsub.f32 %v3013_v55, %v3107_v30 }
 0x1bc   :  { %v631_v12 = vadd.f32 %v630_v7, %v583_v43  ;;  %v587_v51 = vmul.f32 %v3173_v6, %v3173_v6  ;;  %v3203_v26 = vsub.f32 %v3056_v34, %v3079_v14  ;;  %v598_v23 = vmul.f32 %v3179_v9, %v3179_v9 }
 0x1bd   :  { %v612_v59 = vadd.f32 %v611_v50, %v586_v27  ;;  %v3209_v36 = vsub.f32 %v3019_v60, %v3107_v30  ;;  %v589_v55 = vmul.f32 %v3185_v11, %v3185_v11  ;;  %v3215_v45 = vsub.f32 %v3064_v46, %v3079_v14 }
 0x1be   :  { %v632_v24 = vadd.f32 %v631_v12, %v585_v47  ;;  %v600_v34 = vmul.f32 %v3191_v18, %v3191_v18  ;;  %v3221_v27 = vsub.f32 %v3028_v4, %v3107_v30  ;;  %v591_v60 = vmul.f32 %v3197_v22, %v3197_v22 }
 0x1bf   :  { %v613_v1 = vadd.f32 %v612_v59, %v588_v53  ;;  %v3227_v49 = vsub.f32 %v3072_v58, %v3079_v14  ;;  %v602_v46 = vmul.f32 %v3203_v26, %v3203_v26  ;;  %v3233_v53 = vsub.f32 %v3036_v13, %v3107_v30 }
 0x1c0   :  { %v633_v38 = vadd.f32 %v632_v24, %v587_v51  ;;  %v593_v4 = vmul.f32 %v3209_v36, %v3209_v36  ;;  %v3241_v58 = vsub.f32 %v3044_v20, %v3107_v30  ;;  %v595_v14 = vmul.f32 %v3221_v27, %v3221_v27 }
 0x1c1   :  { %v614_v5 = vadd.f32 %v613_v1, %v590_v63  ;;  %v604_v63 = vmul.f32 %v3215_v45, %v3215_v45  ;;  %v606_v13 = vmul.f32 %v3227_v49, %v3227_v49  ;;  %v3255_v20 = vsub.f32 %v3060_v40, %v3107_v30 }
 0x1c2   :  { %v634_v50 = vadd.f32 %v633_v38, %v589_v55  ;;  %v3261_v12 = vsub.f32 %v3068_v52, %v3107_v30  ;;  %v3267_v51 = vsub.f32 %v3076_v62, %v3107_v30 }
 0x1c3   :  { %v615_v10 = vadd.f32 %v614_v5, %v592_v0  ;;  %v3249_v0 = vsub.f32 %v3052_v28, %v3107_v30  ;;  %v597_v5 = vmul.f32 %v3233_v53, %v3233_v53  ;;  %v603_v40 = vmul.f32 %v3255_v20, %v3255_v20 }
 0x1c4   :  { %v635_v59 = vadd.f32 %v634_v50, %v591_v60  ;;  %v607_v38 = vmul.f32 %v3267_v51, %v3267_v51 }
 0x1c5   :  { %v616_v21 = vadd.f32 %v615_v10, %v594_v8  ;;  %v599_v8 = vmul.f32 %v3241_v58, %v3241_v58  ;;  %v601_v28 = vmul.f32 %v3249_v0, %v3249_v0 }
 0x1c6   :  { %v636_v2 = vadd.f32 %v635_v59, %v593_v4 }
 0x1c7   :  { %v617_v33 = vadd.f32 %v616_v21, %v596_v17 }
 0x1c8   :  { %v637_v43 = vadd.f32 %v636_v2, %v595_v14 }
 0x1c9   :  { %v618_v44 = vadd.f32 %v617_v33, %v598_v23  ;;  %v605_v33 = vmul.f32 %v3261_v12, %v3261_v12 }
 0x1ca   :  { %v638_v10 = vadd.f32 %v637_v43, %v597_v5  ;;  %v663_v5 = vlaneseq }
 0x1cb   :  { %v619_v54 = vadd.f32 %v618_v44, %v600_v34 }
 0x1cc   :  { %v639_v17 = vadd.f32 %v638_v10, %v599_v8 }
 0x1cd   :  { %v620_v1 = vadd.f32 %v619_v54, %v602_v46 }
 0x1ce   :  { %v640_v24 = vadd.f32 %v639_v17, %v601_v28 }
 0x1cf   :  { %v621_v3 = vadd.f32 %v620_v1, %v604_v63 }
 0x1d0   :  { %v641_v55 = vadd.f32 %v640_v24, %v603_v40 }
 0x1d1   :  { %v622_v7 = vadd.f32 %v621_v3, %v606_v13  ;;  %v2883_v13 = vmov 1966171168  }
 0x1d2   :  { %v642_v34 = vadd.f32 %v641_v55, %v605_v33  ;;  %v661_v3 = vunpack.c.l.s4 %v2883_v13  ;;  %v719_v33 = vld [vmem:[#allocation7] sm:$0x3] }
 0x1d3   :  { %v623_v47 = vrot.slane %v622_v7, 4 }
 0x1d4   :  { %v643_v44 = vadd.f32 %v642_v34, %v607_v38  ;;  %v662_v43 = vunpack.c.0.s8 %v661_v3 }
 0x1d5   :  { %v624_v21 = vadd.f32 %v623_v47, %v622_v7  ;;  %v664_v7 = vshrl.u32 %v663_v5, 7 }
 0x1d6   :  { %v644_v50 = vrot.slane %v643_v44, 4 }
 0x1d7   :  { %v625_v23 = vrot.slane %v624_v21, 2  ;;  %v3275_v10 = vsub.s32 %v662_v43, %v664_v7  ;;  %v3282_v24 = vsub.s32 0, %v664_v7 }
 0x1d8   :  { %v645_v46 = vadd.f32 %v644_v50, %v643_v44 }
 0x1d9   :  { %v626_v52 = vadd.f32 %v625_v23, %v624_v21  ;;  %v652_v21 = vld [vmem:[%s4233_s2] sm:$0x3]  ;;  %v3284_v23 = vsub.s32 1, %v664_v7  ;;  %v3293_v34 = vrot.slane %v719_v33, %v3282_v24 }
 0x1da   :  { %v646_v30 = vrot.slane %v645_v46, 2 }
 0x1db   :  { %v627_v60 = vrot.slane %v626_v52, 1  ;;  %v3296_v44 = vrot.slane %v719_v33, %v3284_v23 }
 0x1dc   :  { %v647_v54 = vadd.f32 %v646_v30, %v645_v46 }
 0x1dd   :  { %v628_v62 = vadd.f32 %v627_v60, %v626_v52 }
 0x1de   :  { %v648_v59 = vrot.slane %v647_v54, 1 }
 0x1df   :  { %v650_v4 = vmul.f32 0.0078125, %v628_v62 }
 0x1e0   :  { %v649_v63 = vadd.f32 %v648_v59, %v647_v54 }
 0x1e1   :  { %v653_v1 = vadd.f32 1e-05, %v650_v4 }
 0x1e2   :  { %v651_v14 = vmul.f32 0.0078125, %v649_v63 }
 0x1e3   :  { %2665 = vrsqrt.f32 %v653_v1 }
 0x1e4   :  { %v654_v2 = vadd.f32 1e-05, %v651_v14 }
 0x1e6   :  { %2667 = vrsqrt.f32 %v654_v2 }
 0x1f0   :  { %v2666_v8 = vpop.eup %2665 }
 0x1f3   :  { %v2668_v47 = vpop.eup %2667 }
 0x1f4   :  { %v659_v28 = vcombine.low %v2666_v8, %v2668_v47 }
 0x1f6   :  { %v666_v17 = vrot.slane %v659_v28, %v3275_v10 }
 0x1f8   :  { %v673_v40 = vrot.slane %v666_v17, %v3275_v10 }
 0x1fa   :  { %v675_v55 = vmul.f32 %v673_v40, %v652_v21 }
 0x1fc   :  { %v3287_v52 = vrot.slane %v675_v55, %v3282_v24  ;;  %v3290_v38 = vrot.slane %v675_v55, %v3284_v23 }
 0x1fe   :  { %v688_v60 = vmul.f32 %v3290_v38, %v3117_v37  ;;  %v690_v50 = vmul.f32 %v3290_v38, %v3121_v41  ;;  %v687_v46 = vmul.f32 %v3287_v52, %v3083_v15  ;;  %v689_v62 = vmul.f32 %v3287_v52, %v3087_v16 }
 0x1ff   :  { %v692_v30 = vmul.f32 %v3290_v38, %v3137_v31  ;;  %v694_v54 = vmul.f32 %v3290_v38, %v3151_v61  ;;  %v691_v41 = vmul.f32 %v3287_v52, %v3091_v19  ;;  %v693_v31 = vmul.f32 %v3287_v52, %v3099_v25 }
 0x200   :  { %v732_v4 = vadd.f32 %v3296_v44, %v688_v60  ;;  %v734_v59 = vadd.f32 %v3296_v44, %v690_v50  ;;  %v731_v37 = vadd.f32 %v3293_v34, %v687_v46  ;;  %v733_v15 = vadd.f32 %v3293_v34, %v689_v62 }
 0x201   :  { %v736_v63 = vadd.f32 %v3296_v44, %v692_v30  ;;  %v738_v16 = vadd.f32 %v3296_v44, %v694_v54  ;;  %v696_v43 = vmul.f32 %v3290_v38, %v3161_v57  ;;  %v698_v19 = vmul.f32 %v3290_v38, %v3173_v6 }
 0x202   :  { %v764_v1 = vmax.f32 %v732_v4, 0.0  ;;  %v766_v61 = vmax.f32 %v734_v59, 0.0  ;;  %v763_v14 = vmax.f32 %v731_v37, 0.0  ;;  %v765_v2 = vmax.f32 %v733_v15, 0.0 }
 0x203   :  { %v768_v13 = vmax.f32 %v736_v63, 0.0  ;;  %v770_v3 = vmax.f32 %v738_v16, 0.0  ;;  %v735_v8 = vadd.f32 %v3293_v34, %v691_v41  ;;  %v737_v47 = vadd.f32 %v3293_v34, %v693_v31 }
 0x204   :  { %v796_v5 = vpack.c.bf16 %v766_v61, %v764_v1  ;;  %v795_v7 = vpack.c.bf16 %v765_v2, %v763_v14  ;;  %v740_v28 = vadd.f32 %v3296_v44, %v696_v43  ;;  %v742_v17 = vadd.f32 %v3296_v44, %v698_v19 }
 0x205   :  { %v798_v25 = vpack.c.bf16 %v770_v3, %v768_v13  ;;  %v767_v21 = vmax.f32 %v735_v8, 0.0  ;;  %v769_v40 = vmax.f32 %v737_v47, 0.0  ;;  %v695_v57 = vmul.f32 %v3287_v52, %v3103_v29 }
 0x206   :  { %1035 = vmatprep.mubr.bf16.mxu1 %v796_v5  ;;  %v697_v6 = vmul.f32 %v3287_v52, %v3111_v32  ;;  %v772_v33 = vmax.f32 %v740_v28, 0.0  ;;  %v774_v55 = vmax.f32 %v742_v17, 0.0  ;;  %v700_v60 = vmul.f32 %v3290_v38, %v3185_v11 }
 0x207   :  { %1036 = vmatmul.mubr.bf16.vlgmr.msra.gmra.mxu1 %v795_v7  ;;  %v702_v50 = vmul.f32 %v3290_v38, %v3197_v22  ;;  %v797_v46 = vpack.c.bf16 %v769_v40, %v767_v21  ;;  %v739_v62 = vadd.f32 %v3293_v34, %v695_v57  ;;  %v699_v11 = vmul.f32 %v3287_v52, %v3125_v42 }
 0x208   :  { %1045 = vmatprep.mubr.bf16.mxu1 %v798_v25  ;;  %v741_v30 = vadd.f32 %v3293_v34, %v697_v6  ;;  %v800_v54 = vpack.c.bf16 %v774_v55, %v772_v33  ;;  %v744_v4 = vadd.f32 %v3296_v44, %v700_v60  ;;  %v701_v22 = vmul.f32 %v3287_v52, %v3131_v48 }
 0x209   :  { %v746_v29 = vadd.f32 %v3296_v44, %v702_v50  ;;  %v771_v32 = vmax.f32 %v739_v62, 0.0  ;;  %v704_v15 = vmul.f32 %v3290_v38, %v3209_v36  ;;  %v706_v63 = vmul.f32 %v3290_v38, %v3221_v27 }
 0x20a   :  { %v773_v59 = vmax.f32 %v741_v30, 0.0  ;;  %v776_v37 = vmax.f32 %v744_v4, 0.0  ;;  %v743_v31 = vadd.f32 %v3293_v34, %v699_v11  ;;  %v745_v1 = vadd.f32 %v3293_v34, %v701_v22 }
 0x20b   :  { %v778_v41 = vmax.f32 %v746_v29, 0.0  ;;  %v748_v14 = vadd.f32 %v3296_v44, %v704_v15  ;;  %v750_v42 = vadd.f32 %v3296_v44, %v706_v63  ;;  %v703_v36 = vmul.f32 %v3287_v52, %v3145_v56 }
 0x20c   :  { %v799_v16 = vpack.c.bf16 %v773_v59, %v771_v32  ;;  %v775_v48 = vmax.f32 %v743_v31, 0.0  ;;  %v777_v2 = vmax.f32 %v745_v1, 0.0  ;;  %v705_v27 = vmul.f32 %v3287_v52, %v3155_v35 }
 0x20d   :  { %v802_v61 = vpack.c.bf16 %v778_v41, %v776_v37  ;;  %v780_v13 = vmax.f32 %v748_v14, 0.0  ;;  %v782_v3 = vmax.f32 %v750_v42, 0.0  ;;  %v708_v5 = vmul.f32 %v3290_v38, %v3233_v53  ;;  %v2603_v14 = vld [vmem:[#allocation11 + $0x74] ss:$8 sps:$4 sm:$0xff]   ;;  %v2601_v42 = vld [vmem:[#allocation11 + $0x70] ss:$8 sps:$4 sm:$0xff]  }
 0x20e   :  { %v710_v43 = vmul.f32 %v3290_v38, %v3241_v58  ;;  %v801_v19 = vpack.c.bf16 %v777_v2, %v775_v48  ;;  %v747_v7 = vadd.f32 %v3293_v34, %v703_v36  ;;  %v749_v8 = vadd.f32 %v3293_v34, %v705_v27  ;;  %1619 = vmatprep.subr.bf16.mxu0 %v2603_v14  ;;  %v2609_v48 = vld [vmem:[#allocation11 + $0x54] ss:$8 sps:$4 sm:$0xff]   ;;  %v2612_v27 = vld [vmem:[#allocation11 + $0x44] ss:$8 sps:$4 sm:$0xff]   ;;  %v2640_v14 = vld [vmem:[#allocation11 + $0xa0] ss:$8 sps:$4 sm:$0xff]  }
 0x20f   :  { %1046 = vmatmul.mubr.bf16.gmra.mxu1 %v797_v46  ;;  %v804_v47 = vpack.c.bf16 %v782_v3, %v780_v13  ;;  %v752_v25 = vadd.f32 %v3296_v44, %v708_v5  ;;  %v707_v53 = vmul.f32 %v3287_v52, %v3167_v39  ;;  %v709_v58 = vmul.f32 %v3287_v52, %v3179_v9  ;;  %v2610_v3 = vld [vmem:[#allocation11 + $0x40] ss:$8 sps:$4 sm:$0xff]  }
 0x210   :  { %1055 = vmatprep.mubr.bf16.mxu1 %v800_v54  ;;  %v754_v56 = vadd.f32 %v3296_v44, %v710_v43  ;;  %v779_v35 = vmax.f32 %v747_v7, 0.0  ;;  %v781_v28 = vmax.f32 %v749_v8, 0.0  ;;  %v712_v40 = vmul.f32 %v3290_v38, %v3249_v0  ;;  %1620 = vmatpush1.bf16.msra.mxu0 %v2601_v42  ;;  %v2615_v43 = vld [vmem:[#allocation11 + $0x34] ss:$8 sps:$4 sm:$0xff]   ;;  %v2613_v7 = vld [vmem:[#allocation11 + $0x30] ss:$8 sps:$4 sm:$0xff]  }
 0x211   :  { %v784_v17 = vmax.f32 %v752_v25, 0.0  ;;  %v714_v57 = vmul.f32 %v3290_v38, %v3255_v20  ;;  %v751_v33 = vadd.f32 %v3293_v34, %v707_v53  ;;  %v753_v55 = vadd.f32 %v3293_v34, %v709_v58  ;;  %v2619_v58 = vld [vmem:[#allocation11 + $0x10] ss:$8 sps:$4 sm:$0xff]  }
 0x212   :  { %v786_v21 = vmax.f32 %v754_v56, 0.0  ;;  %v803_v6 = vpack.c.bf16 %v781_v28, %v779_v35  ;;  %v756_v50 = vadd.f32 %v3296_v44, %v712_v40  ;;  %v711_v0 = vmul.f32 %v3287_v52, %v3191_v18  ;;  %v2616_v56 = vld [vmem:[#allocation11 + $0x20] ss:$8 sps:$4 sm:$0xff]   ;;  %v2621_v28 = vld [vmem:[#allocation11 + $0x14] ss:$8 sps:$4 sm:$0xff]  }
 0x213   :  { %v758_v39 = vadd.f32 %v3296_v44, %v714_v57  ;;  %v783_v9 = vmax.f32 %v751_v33, 0.0  ;;  %v785_v46 = vmax.f32 %v753_v55, 0.0  ;;  %v713_v20 = vmul.f32 %v3287_v52, %v3203_v26  ;;  %v2622_v57 = vld [vmem:[#allocation11] ss:$8 sps:$4 sm:$0xff]   ;;  %v2627_v33 = vld [vmem:[#allocation11 + $0xf4] ss:$8 sps:$4 sm:$0xff]  }
 0x214   :  { %v806_v60 = vpack.c.bf16 %v786_v21, %v784_v17  ;;  %v718_v62 = vmul.f32 %v3290_v38, %v3267_v51  ;;  %v788_v30 = vmax.f32 %v756_v50, 0.0  ;;  %v716_v4 = vmul.f32 %v3290_v38, %v3261_v12  ;;  %v2624_v21 = vld [vmem:[#allocation11 + $0x4] ss:$8 sps:$4 sm:$0xff]  }
 0x215   :  { %v790_v54 = vmax.f32 %v758_v39, 0.0  ;;  %v805_v29 = vpack.c.bf16 %v785_v46, %v783_v9  ;;  %v755_v32 = vadd.f32 %v3293_v34, %v711_v0  ;;  %v757_v59 = vadd.f32 %v3293_v34, %v713_v20  ;;  %v2630_v39 = vld [vmem:[#allocation11 + $0xe4] ss:$8 sps:$4 sm:$0xff]   ;;  %v2628_v46 = vld [vmem:[#allocation11 + $0xe0] ss:$8 sps:$4 sm:$0xff]  }
 0x216   :  { %v762_v11 = vadd.f32 %v3296_v44, %v718_v62  ;;  %v760_v18 = vadd.f32 %v3296_v44, %v716_v4  ;;  %v715_v51 = vmul.f32 %v3287_v52, %v3215_v45  ;;  %v717_v12 = vmul.f32 %v3287_v52, %v3227_v49  ;;  %v2606_v45 = vld [vmem:[#allocation11 + $0x64] ss:$8 sps:$4 sm:$0xff]   ;;  %v2604_v49 = vld [vmem:[#allocation11 + $0x60] ss:$8 sps:$4 sm:$0xff]   ;;  %v2633_v62 = vld [vmem:[#allocation11 + $0xd4] ss:$8 sps:$4 sm:$0xff]  }
 0x217   :  { %1056 = vmatmul.mubr.bf16.gmra.mxu1 %v799_v16  ;;  %v808_v22 = vpack.c.bf16 %v790_v54, %v788_v30  ;;  %v787_v26 = vmax.f32 %v755_v32, 0.0  ;;  %v789_v37 = vmax.f32 %v757_v59, 0.0  ;;  %1621 = vmatprep.subr.bf16.mxu0 %v2606_v45  ;;  %v2631_v54 = vld [vmem:[#allocation11 + $0xd0] ss:$8 sps:$4 sm:$0xff]  }
 0x218   :  { %1065 = vmatprep.mubr.bf16.mxu1 %v802_v61  ;;  %v792_v38 = vmax.f32 %v760_v18, 0.0  ;;  %v794_v41 = vmax.f32 %v762_v11, 0.0  ;;  %v759_v63 = vadd.f32 %v3293_v34, %v715_v51  ;;  %v761_v16 = vadd.f32 %v3293_v34, %v717_v12  ;;  %1622 = vmatpush1.bf16.msra.mxu0 %v2604_v49  ;;  %v2607_v34 = vld [vmem:[#allocation11 + $0x50] ss:$8 sps:$4 sm:$0xff]   ;;  %v2645_v49 = vld [vmem:[#allocation11 + $0x94] ss:$8 sps:$4 sm:$0xff]  }
 0x219   :  { %v807_v15 = vpack.c.bf16 %v789_v37, %v787_v26  ;;  %1623 = vmatprep.subr.bf16.mxu0 %v2609_v48  ;;  %v2634_v26 = vld [vmem:[#allocation11 + $0xc0] ss:$8 sps:$4 sm:$0xff]  }
 0x21a   :  { %v810_v31 = vpack.c.bf16 %v794_v41, %v792_v38  ;;  %v791_v44 = vmax.f32 %v759_v63, 0.0  ;;  %v793_v1 = vmax.f32 %v761_v16, 0.0  ;;  %v2637_v38 = vld [vmem:[#allocation11 + $0xb0] ss:$8 sps:$4 sm:$0xff]   ;;  %v2639_v41 = vld [vmem:[#allocation11 + $0xb4] ss:$8 sps:$4 sm:$0xff]  }
 0x21b   :  { %v2642_v16 = vld [vmem:[#allocation11 + $0xa4] ss:$8 sps:$4 sm:$0xff]  }
 0x21c   :  { %v809_v61 = vpack.c.bf16 %v793_v1, %v791_v44  ;;  %1624 = vmatpush1.bf16.msra.mxu0 %v2607_v34 }
 0x21d   :  { %1625 = vmatprep.subr.bf16.mxu0 %v2612_v27 }
 0x21f   :  { %1066 = vmatmul.mubr.bf16.gmra.mxu1 %v801_v19 }
 0x220   :  { %1075 = vmatprep.mubr.bf16.mxu1 %v804_v47  ;;  %1626 = vmatpush1.bf16.msra.mxu0 %v2610_v3  ;;  %v2618_v47 = vld [vmem:[#allocation11 + $0x24] ss:$8 sps:$4 sm:$0xff]  }
 0x221   :  { %1627 = vmatprep.subr.bf16.mxu0 %v2615_v43  ;;  %v2643_v43 = vld [vmem:[#allocation11 + $0x90] ss:$8 sps:$4 sm:$0xff]  }
 0x224   :  { %1628 = vmatpush1.bf16.msra.mxu0 %v2613_v7 }
 0x225   :  { %1629 = vmatprep.subr.bf16.mxu0 %v2618_v47 }
 0x227   :  { %1076 = vmatmul.mubr.bf16.gmra.mxu1 %v803_v6 }
 0x228   :  { %1085 = vmatprep.mubr.bf16.mxu1 %v806_v60  ;;  %1630 = vmatpush1.bf16.msra.mxu0 %v2616_v56  ;;  %v2625_v60 = vld [vmem:[#allocation11 + $0xf0] ss:$8 sps:$4 sm:$0xff]   ;;  %v2648_v56 = vld [vmem:[#allocation11 + $0x84] ss:$8 sps:$4 sm:$0xff]  }
 0x229   :  { %1631 = vmatprep.subr.bf16.mxu0 %v2621_v28 }
 0x22c   :  { %1632 = vmatpush1.bf16.msra.mxu0 %v2619_v58 }
 0x22d   :  { %1633 = vmatprep.subr.bf16.mxu0 %v2624_v21 }
 0x22f   :  { %1086 = vmatmul.mubr.bf16.gmra.mxu1 %v805_v29 }
 0x230   :  { %1095 = vmatprep.mubr.bf16.mxu1 %v808_v22  ;;  %1634 = vmatpush1.bf16.msra.mxu0 %v2622_v57  ;;  %v2636_v22 = vld [vmem:[#allocation11 + $0xc4] ss:$8 sps:$4 sm:$0xff]  }
 0x231   :  { %1635 = vmatprep.subr.bf16.mxu0 %v2627_v33  ;;  %v2646_v33 = vld [vmem:[#allocation11 + $0x80] ss:$8 sps:$4 sm:$0xff]  }
 0x234   :  { %1636 = vmatpush2.bf16.msra.mxu0 %v2625_v60 }
 0x235   :  { %1637 = vmatprep.subr.bf16.mxu0 %v2630_v39 }
 0x237   :  { %1096 = vmatmul.mubr.bf16.gmra.mxu1 %v807_v15 }
 0x238   :  { %1105 = vmatprep.mubr.bf16.mxu1 %v810_v31  ;;  %1638 = vmatpush2.bf16.msra.mxu0 %v2628_v46 }
 0x239   :  { %1639 = vmatprep.subr.bf16.mxu0 %v2633_v62 }
 0x23c   :  { %1640 = vmatpush2.bf16.msra.mxu0 %v2631_v54 }
 0x23d   :  { %1641 = vmatprep.subr.bf16.mxu0 %v2636_v22 }
 0x23f   :  { %1106 = vmatmul.mubr.bf16.gmra.mxu1 %v809_v61 }
 0x240   :  { %1642 = vmatpush2.bf16.msra.mxu0 %v2634_v26 }
 0x241   :  { %1643 = vmatprep.subr.bf16.mxu0 %v2639_v41 }
 0x244   :  { %1644 = vmatpush2.bf16.msra.mxu0 %v2637_v38 }
 0x245   :  { %1645 = vmatprep.subr.bf16.mxu0 %v2642_v16 }
 0x248   :  { %1646 = vmatpush2.bf16.msra.mxu0 %v2640_v14 }
 0x249   :  { %1647 = vmatprep.subr.bf16.mxu0 %v2645_v49 }
 0x24c   :  { %1648 = vmatpush2.bf16.msra.mxu0 %v2643_v43 }
 0x24d   :  { %1649 = vmatprep.subr.bf16.mxu0 %v2648_v56 }
 0x250   :  { %1650 = vmatpush2.bf16.msra.mxu0 %v2646_v33 }
 0x2c7   :  { %v3394_v52 = vpop.f32.mrf.mxu1 }
 0x2c9   :  { %v3396_v2 = vpop.f32.mrf.mxu1 }
 0x2cb   :  { %v3398_v36 = vpop.f32.mrf.mxu1 }
 0x2cc   :  { %v1116_v20 = vadd.f32 %v3398_v36, %v3394_v52 }
 0x2cd   :  { %v3400_v13 = vpop.f32.mrf.mxu1 }
 0x2ce   :  { %v1137_v4 = vadd.f32 %v3400_v13, %v3396_v2 }
 0x2cf   :  { %v3402_v5 = vpop.f32.mrf.mxu1 }
 0x2d0   :  { %v1117_v29 = vadd.f32 %v1116_v20, %v3402_v5 }
 0x2d1   :  { %v3404_v19 = vpop.f32.mrf.mxu1 }
 0x2d2   :  { %v1138_v59 = vadd.f32 %v1137_v4, %v3404_v19 }
 0x2d3   :  { %v3406_v8 = vpop.f32.mrf.mxu1 }
 0x2d4   :  { %v1118_v11 = vadd.f32 %v1117_v29, %v3406_v8 }
 0x2d5   :  { %v3408_v25 = vpop.f32.mrf.mxu1 }
 0x2d6   :  { %v1139_v37 = vadd.f32 %v1138_v59, %v3408_v25 }
 0x2d7   :  { %v3410_v35 = vpop.f32.mrf.mxu1 }
 0x2d8   :  { %v1119_v51 = vadd.f32 %v1118_v11, %v3410_v35 }
 0x2d9   :  { %v3412_v53 = vpop.f32.mrf.mxu1 }
 0x2da   :  { %v1140_v15 = vadd.f32 %v1139_v37, %v3412_v53 }
 0x2db   :  { %v3414_v17 = vpop.f32.mrf.mxu1 }
 0x2dc   :  { %v1120_v63 = vadd.f32 %v1119_v51, %v3414_v17 }
 0x2dd   :  { %v3416_v40 = vpop.f32.mrf.mxu1 }
 0x2de   :  { %v1141_v44 = vadd.f32 %v1140_v15, %v3416_v40 }
 0x2df   :  { %v3418_v6 = vpop.f32.mrf.mxu1 }
 0x2e0   :  { %v1121_v1 = vadd.f32 %v1120_v63, %v3418_v6 }
 0x2e1   :  { %v3420_v55 = vpop.f32.mrf.mxu1 }
 0x2e2   :  { %v1142_v42 = vadd.f32 %v1141_v44, %v3420_v55 }
 0x2e3   :  { %v3422_v50 = vpop.f32.mrf.mxu1 }
 0x2e4   :  { %v1122_v45 = vadd.f32 %v1121_v1, %v3422_v50 }
 0x2e5   :  { %v3424_v9 = vpop.f32.mrf.mxu1 }
 0x2e6   :  { %v1143_v34 = vadd.f32 %v1142_v42, %v3424_v9 }
 0x2e7   :  { %v3426_v0 = vpop.f32.mrf.mxu1 }
 0x2e8   :  { %v1123_v27 = vadd.f32 %v1122_v45, %v3426_v0 }
 0x2e9   :  { %v3430_v30 = vpop.f32.mrf.mxu1 }
 0x2ea   :  { %v1144_v7 = vadd.f32 %v1143_v34, %v3430_v30 }
 0x2eb   :  { %v3435_v32 = vpop.f32.mrf.mxu1 }
 0x2ec   :  { %v1124_v47 = vadd.f32 %v1123_v27, %v3435_v32 }
 0x2ed   :  { %v3439_v18 = vpop.f32.mrf.mxu1 }
 0x2ee   :  { %v1145_v58 = vadd.f32 %v1144_v7, %v3439_v18 }
 0x2ef   :  { %v3443_v12 = vpop.f32.mrf.mxu1 }
 0x2f0   :  { %v1125_v21 = vadd.f32 %v1124_v47, %v3443_v12 }
 0x2f1   :  { %v3447_v31 = vpop.f32.mrf.mxu1 }
 0x2f2   :  { %v1146_v60 = vadd.f32 %v1145_v58, %v3447_v31 }
 0x2f3   :  { %v3451_v61 = vpop.f32.mrf.mxu1 }
 0x2f4   :  { %v1126_v39 = vadd.f32 %v1125_v21, %v3451_v61 }
 0x2f5   :  { %v3455_v48 = vpop.f32.mrf.mxu1 }
 0x2f6   :  { %v1147_v20 = vadd.f32 %v1146_v60, %v3455_v48 }
 0x2f7   :  { %v3459_v3 = vpop.f32.mrf.mxu1 }
 0x2f8   :  { %v1127_v62 = vadd.f32 %v1126_v39, %v3459_v3 }
 0x2f9   :  { %v3463_v28 = vpop.f32.mrf.mxu1 }
 0x2fa   :  { %v1148_v4 = vadd.f32 %v1147_v20, %v3463_v28 }
 0x2fb   :  { %v3467_v57 = vpop.f32.mrf.mxu1 }
 0x2fc   :  { %v1128_v29 = vadd.f32 %v1127_v62, %v3467_v57 }
 0x2fd   :  { %v3471_v46 = vpop.f32.mrf.mxu1 }
 0x2fe   :  { %v1149_v11 = vadd.f32 %v1148_v4, %v3471_v46 }
 0x2ff   :  { %v3475_v54 = vpop.f32.mrf.mxu1 }
 0x300   :  { %v1129_v22 = vadd.f32 %v1128_v29, %v3475_v54 }
 0x301   :  { %v3479_v59 = vpop.f32.mrf.mxu1 }
 0x302   :  { %v1150_v37 = vadd.f32 %v1149_v11, %v3479_v59 }
 0x303   :  { %v3483_v26 = vpop.f32.mrf.mxu1 }
 0x304   :  { %v1130_v51 = vadd.f32 %v1129_v22, %v3483_v26 }
 0x305   :  { %v3487_v38 = vpop.f32.mrf.mxu1 }
 0x306   :  { %v1131_v41 = vrot.slane %v1130_v51, 4  ;;  %v1151_v15 = vadd.f32 %v1150_v37, %v3487_v38 }
 0x308   :  { %v1132_v63 = vadd.f32 %v1131_v41, %v1130_v51  ;;  %v1152_v16 = vrot.slane %v1151_v15, 4 }
 0x30a   :  { %v1133_v44 = vrot.slane %v1132_v63, 2  ;;  %v1153_v1 = vadd.f32 %v1152_v16, %v1151_v15 }
 0x30c   :  { %v1134_v14 = vadd.f32 %v1133_v44, %v1132_v63  ;;  %v1154_v42 = vrot.slane %v1153_v1, 2 }
 0x30e   :  { %v1135_v45 = vrot.slane %v1134_v14, 1  ;;  %v1155_v34 = vadd.f32 %v1154_v42, %v1153_v1 }
 0x310   :  { %v1136_v49 = vadd.f32 %v1135_v45, %v1134_v14  ;;  %v1156_v47 = vrot.slane %v1155_v34, 1 }
 0x312   :  { %v3490_v27 = vmul.f32 0.0078125, %v1136_v49  ;;  %v1157_v33 = vadd.f32 %v1156_v47, %v1155_v34 }
 0x314   :  { %v3494_v43 = vsub.f32 %v3394_v52, %v3490_v27  ;;  %v3498_v7 = vsub.f32 %v3398_v36, %v3490_v27  ;;  %v3502_v56 = vsub.f32 %v3402_v5, %v3490_v27  ;;  %v3510_v52 = vsub.f32 %v3406_v8, %v3490_v27 }
 0x315   :  { %v3514_v36 = vsub.f32 %v3410_v35, %v3490_v27  ;;  %v3518_v39 = vmul.f32 0.0078125, %v1157_v33  ;;  %v3522_v20 = vsub.f32 %v3414_v17, %v3490_v27  ;;  %v3536_v29 = vsub.f32 %v3418_v6, %v3490_v27 }
 0x316   :  { %v1192_v58 = vmul.f32 %v3494_v43, %v3494_v43  ;;  %v1194_v21 = vmul.f32 %v3498_v7, %v3498_v7  ;;  %v1196_v60 = vmul.f32 %v3502_v56, %v3502_v56  ;;  %v1198_v62 = vmul.f32 %v3510_v52, %v3510_v52 }
 0x317   :  { %v3528_v8 = vsub.f32 %v3396_v2, %v3518_v39  ;;  %v3532_v35 = vsub.f32 %v3400_v13, %v3518_v39  ;;  %v1200_v17 = vmul.f32 %v3514_v36, %v3514_v36  ;;  %v3542_v22 = vsub.f32 %v3422_v50, %v3490_v27 }
 0x318   :  { %v1224_v5 = vadd.f32 %v1194_v21, %v1192_v58  ;;  %v1202_v2 = vmul.f32 %v3522_v20, %v3522_v20  ;;  %v3548_v13 = vsub.f32 %v3404_v19, %v3518_v39  ;;  %v3556_v41 = vsub.f32 %v3426_v0, %v3490_v27 }
 0x319   :  { %v1193_v6 = vmul.f32 %v3528_v8, %v3528_v8  ;;  %v1195_v51 = vmul.f32 %v3532_v35, %v3532_v35  ;;  %v1204_v50 = vmul.f32 %v3536_v29, %v3536_v29  ;;  %v3562_v63 = vsub.f32 %v3408_v25, %v3518_v39 }
 0x31a   :  { %v1225_v4 = vadd.f32 %v1224_v5, %v1196_v60  ;;  %v3566_v19 = vsub.f32 %v3435_v32, %v3490_v27  ;;  %v1206_v16 = vmul.f32 %v3542_v22, %v3542_v22  ;;  %v3572_v0 = vsub.f32 %v3412_v53, %v3518_v39 }
 0x31b   :  { %v1197_v1 = vmul.f32 %v3548_v13, %v3548_v13  ;;  %v1245_v14 = vadd.f32 %v1195_v51, %v1193_v6  ;;  %v3578_v25 = vsub.f32 %v3443_v12, %v3490_v27  ;;  %v1208_v32 = vmul.f32 %v3556_v41, %v3556_v41 }
 0x31c   :  { %v1226_v11 = vadd.f32 %v1225_v4, %v1198_v62  ;;  %v3584_v45 = vsub.f32 %v3416_v40, %v3518_v39  ;;  %v1199_v53 = vmul.f32 %v3562_v63, %v3562_v63  ;;  %v3590_v34 = vsub.f32 %v3451_v61, %v3490_v27 }
 0x31d   :  { %v1246_v49 = vadd.f32 %v1245_v14, %v1197_v1  ;;  %v1210_v12 = vmul.f32 %v3566_v19, %v3566_v19  ;;  %v3596_v58 = vsub.f32 %v3420_v55, %v3518_v39  ;;  %v1201_v40 = vmul.f32 %v3572_v0, %v3572_v0 }
 0x31e   :  { %v1227_v37 = vadd.f32 %v1226_v11, %v1200_v17  ;;  %v3602_v33 = vsub.f32 %v3459_v3, %v3490_v27  ;;  %v1212_v61 = vmul.f32 %v3578_v25, %v3578_v25  ;;  %v3608_v5 = vsub.f32 %v3424_v9, %v3518_v39 }
 0x31f   :  { %v1247_v21 = vadd.f32 %v1246_v49, %v1199_v53  ;;  %v1203_v55 = vmul.f32 %v3584_v45, %v3584_v45  ;;  %v3614_v4 = vsub.f32 %v3467_v57, %v3490_v27  ;;  %v1214_v3 = vmul.f32 %v3590_v34, %v3590_v34 }
 0x320   :  { %v1228_v15 = vadd.f32 %v1227_v37, %v1202_v2  ;;  %v3620_v11 = vsub.f32 %v3430_v30, %v3518_v39  ;;  %v1205_v9 = vmul.f32 %v3596_v58, %v3596_v58  ;;  %v3626_v37 = vsub.f32 %v3475_v54, %v3490_v27 }
 0x321   :  { %v1248_v62 = vadd.f32 %v1247_v21, %v1201_v40  ;;  %v1216_v57 = vmul.f32 %v3602_v33, %v3602_v33  ;;  %v3632_v51 = vsub.f32 %v3439_v18, %v3518_v39  ;;  %v1207_v30 = vmul.f32 %v3608_v5, %v3608_v5 }
 0x322   :  { %v1229_v44 = vadd.f32 %v1228_v15, %v1204_v50  ;;  %v3638_v15 = vsub.f32 %v3483_v26, %v3490_v27  ;;  %v1218_v54 = vmul.f32 %v3614_v4, %v3614_v4  ;;  %v1209_v18 = vmul.f32 %v3620_v11, %v3620_v11 }
 0x323   :  { %v1249_v2 = vadd.f32 %v1248_v62, %v1203_v55  ;;  %v1220_v14 = vmul.f32 %v3626_v37, %v3626_v37  ;;  %v3652_v26 = vsub.f32 %v3455_v48, %v3518_v39  ;;  %v1211_v27 = vmul.f32 %v3632_v51, %v3632_v51 }
 0x324   :  { %v1230_v42 = vadd.f32 %v1229_v44, %v1206_v16  ;;  %v3644_v44 = vsub.f32 %v3447_v31, %v3518_v39  ;;  %v1222_v31 = vmul.f32 %v3638_v15, %v3638_v15  ;;  %v3660_v49 = vsub.f32 %v3463_v28, %v3518_v39 }
 0x325   :  { %v1250_v50 = vadd.f32 %v1249_v2, %v1205_v9  ;;  %v3666_v48 = vsub.f32 %v3471_v46, %v3518_v39  ;;  %v1215_v21 = vmul.f32 %v3652_v26, %v3652_v26  ;;  %v3672_v55 = vsub.f32 %v3479_v59, %v3518_v39 }
 0x326   :  { %v1231_v47 = vadd.f32 %v1230_v42, %v1208_v32  ;;  %v1217_v28 = vmul.f32 %v3660_v49, %v3660_v49 }
 0x327   :  { %v1251_v1 = vadd.f32 %v1250_v50, %v1207_v30  ;;  %v1219_v46 = vmul.f32 %v3666_v48, %v3666_v48 }
 0x328   :  { %v1232_v60 = vadd.f32 %v1231_v47, %v1210_v12  ;;  %v1213_v12 = vmul.f32 %v3644_v44, %v3644_v44 }
 0x329   :  { %v1252_v42 = vadd.f32 %v1251_v1, %v1209_v18 }
 0x32a   :  { %v1233_v17 = vadd.f32 %v1232_v60, %v1212_v61 }
 0x32b   :  { %v1253_v47 = vadd.f32 %v1252_v42, %v1211_v27 }
 0x32c   :  { %v1234_v6 = vadd.f32 %v1233_v17, %v1214_v3  ;;  %v3678_v17 = vsub.f32 %v3487_v38, %v3518_v39 }
 0x32d   :  { %v1254_v61 = vadd.f32 %v1253_v47, %v1213_v12 }
 0x32e   :  { %v1235_v16 = vadd.f32 %v1234_v6, %v1216_v57  ;;  %v1221_v57 = vmul.f32 %v3672_v55, %v3672_v55  ;;  %v1223_v30 = vmul.f32 %v3678_v17, %v3678_v17 }
 0x32f   :  { %v1255_v62 = vadd.f32 %v1254_v61, %v1215_v21 }
 0x330   :  { %v1236_v32 = vadd.f32 %v1235_v16, %v1218_v54 }
 0x331   :  { %v1256_v9 = vadd.f32 %v1255_v62, %v1217_v28  ;;  %v1335_v62 = vld [vmem:[#allocation10] sm:$0x3] }
 0x332   :  { %v1237_v53 = vadd.f32 %v1236_v32, %v1220_v14 }
 0x333   :  { %v1257_v6 = vadd.f32 %v1256_v9, %v1219_v46  ;;  %v3692_v46 = vrot.slane %v1335_v62, %v3282_v24  ;;  %v3695_v9 = vrot.slane %v1335_v62, %v3284_v23 }
 0x334   :  { %v1238_v40 = vadd.f32 %v1237_v53, %v1222_v31 }
 0x335   :  { %v1258_v50 = vadd.f32 %v1257_v6, %v1221_v57 }
 0x336   :  { %v1239_v60 = vrot.slane %v1238_v40, 4 }
 0x337   :  { %v1259_v54 = vadd.f32 %v1258_v50, %v1223_v30 }
 0x338   :  { %v1240_v3 = vadd.f32 %v1239_v60, %v1238_v40  ;;  %v1268_v60 = vld [vmem:[%s4236_s5] sm:$0x3] }
 0x339   :  { %v1260_v18 = vrot.slane %v1259_v54, 4 }
 0x33a   :  { %v1241_v2 = vrot.slane %v1240_v3, 2 }
 0x33b   :  { %v1261_v1 = vadd.f32 %v1260_v18, %v1259_v54 }
 0x33c   :  { %v1242_v59 = vadd.f32 %v1241_v2, %v1240_v3 }
 0x33d   :  { %v1262_v39 = vrot.slane %v1261_v1, 2 }
 0x33e   :  { %v1243_v16 = vrot.slane %v1242_v59, 1 }
 0x33f   :  { %v1263_v14 = vadd.f32 %v1262_v39, %v1261_v1 }
 0x340   :  { %v1244_v38 = vadd.f32 %v1243_v16, %v1242_v59 }
 0x341   :  { %v1264_v27 = vrot.slane %v1263_v14, 1 }
 0x342   :  { %v1266_v32 = vmul.f32 0.0078125, %v1244_v38 }
 0x343   :  { %v1265_v42 = vadd.f32 %v1264_v27, %v1263_v14 }
 0x344   :  { %v1269_v31 = vadd.f32 1e-05, %v1266_v32 }
 0x345   :  { %v1267_v53 = vmul.f32 0.0078125, %v1265_v42 }
 0x346   :  { %2669 = vrsqrt.f32 %v1269_v31 }
 0x347   :  { %v1270_v12 = vadd.f32 1e-05, %v1267_v53 }
 0x349   :  { %2671 = vrsqrt.f32 %v1270_v12 }
 0x353   :  { %v2670_v47 = vpop.eup %2669 }
 0x356   :  { %v2672_v40 = vpop.eup %2671 }
 0x357   :  { %v1275_v21 = vcombine.low %v2670_v47, %v2672_v40 }
 0x359   :  { %v1282_v61 = vrot.slane %v1275_v21, %v3275_v10 }
 0x35b   :  { %v1289_v28 = vrot.slane %v1282_v61, %v3275_v10 }
 0x35d   :  { %v1291_v3 = vmul.f32 %v1289_v28, %v1268_v60 }
 0x35f   :  { %v3698_v2 = vrot.slane %v1291_v3, %v3282_v24  ;;  %v3701_v57 = vrot.slane %v1291_v3, %v3284_v23 }
 0x361   :  { %v1304_v6 = vmul.f32 %v3701_v57, %v3528_v8  ;;  %v1306_v59 = vmul.f32 %v3701_v57, %v3532_v35  ;;  %v1303_v30 = vmul.f32 %v3698_v2, %v3494_v43  ;;  %v1305_v50 = vmul.f32 %v3698_v2, %v3498_v7 }
 0x362   :  { %v1308_v54 = vmul.f32 %v3701_v57, %v3548_v13  ;;  %v1310_v16 = vmul.f32 %v3701_v57, %v3562_v63  ;;  %v1307_v35 = vmul.f32 %v3698_v2, %v3502_v56  ;;  %v1309_v13 = vmul.f32 %v3698_v2, %v3510_v52 }
 0x363   :  { %v1348_v18 = vadd.f32 %v3695_v9, %v1304_v6  ;;  %v1350_v1 = vadd.f32 %v3695_v9, %v1306_v59  ;;  %v1347_v8 = vadd.f32 %v3692_v46, %v1303_v30  ;;  %v1349_v43 = vadd.f32 %v3692_v46, %v1305_v50 }
 0x364   :  { %v1352_v38 = vadd.f32 %v3695_v9, %v1308_v54  ;;  %v1354_v7 = vadd.f32 %v3695_v9, %v1310_v16  ;;  %v1312_v53 = vmul.f32 %v3701_v57, %v3572_v0  ;;  %v1314_v56 = vmul.f32 %v3701_v57, %v3584_v45 }
 0x365   :  { %v1380_v39 = vmax.f32 %v1348_v18, 0.0  ;;  %v1382_v63 = vmax.f32 %v1350_v1, 0.0  ;;  %v1379_v14 = vmax.f32 %v1347_v8, 0.0  ;;  %v1381_v32 = vmax.f32 %v1349_v43, 0.0 }
 0x366   :  { %v1384_v27 = vmax.f32 %v1352_v38, 0.0  ;;  %v1386_v42 = vmax.f32 %v1354_v7, 0.0  ;;  %v1351_v47 = vadd.f32 %v3692_v46, %v1307_v35  ;;  %v1353_v40 = vadd.f32 %v3692_v46, %v1309_v13 }
 0x367   :  { %v1412_v31 = vpack.c.bf16 %v1382_v63, %v1380_v39  ;;  %v1411_v12 = vpack.c.bf16 %v1381_v32, %v1379_v14  ;;  %v1356_v21 = vadd.f32 %v3695_v9, %v1312_v53  ;;  %v1358_v61 = vadd.f32 %v3695_v9, %v1314_v56 }
 0x368   :  { %v1414_v52 = vpack.c.bf16 %v1386_v42, %v1384_v27  ;;  %v1383_v60 = vmax.f32 %v1351_v47, 0.0  ;;  %v1385_v28 = vmax.f32 %v1353_v40, 0.0  ;;  %v1311_v0 = vmul.f32 %v3698_v2, %v3514_v36 }
 0x369   :  { %1651 = vmatprep.mubr.bf16.mxu0 %v1412_v31  ;;  %v1313_v45 = vmul.f32 %v3698_v2, %v3522_v20  ;;  %v1388_v62 = vmax.f32 %v1356_v21, 0.0  ;;  %v1390_v3 = vmax.f32 %v1358_v61, 0.0  ;;  %v1316_v6 = vmul.f32 %v3701_v57, %v3596_v58 }
 0x36a   :  { %1652 = vmatmul.mubr.bf16.vlgmr.msra.gmra.mxu0 %v1411_v12  ;;  %v1318_v59 = vmul.f32 %v3701_v57, %v3608_v5  ;;  %v1413_v30 = vpack.c.bf16 %v1385_v28, %v1383_v60  ;;  %v1355_v50 = vadd.f32 %v3692_v46, %v1311_v0  ;;  %v1315_v58 = vmul.f32 %v3698_v2, %v3536_v29 }
 0x36b   :  { %1661 = vmatprep.mubr.bf16.mxu0 %v1414_v52  ;;  %v1357_v54 = vadd.f32 %v3692_v46, %v1313_v45  ;;  %v1416_v16 = vpack.c.bf16 %v1390_v3, %v1388_v62  ;;  %v1360_v18 = vadd.f32 %v3695_v9, %v1316_v6  ;;  %v1317_v5 = vmul.f32 %v3698_v2, %v3542_v22 }
 0x36c   :  { %v1362_v36 = vadd.f32 %v3695_v9, %v1318_v59  ;;  %v1387_v20 = vmax.f32 %v1355_v50, 0.0  ;;  %v1320_v43 = vmul.f32 %v3701_v57, %v3620_v11  ;;  %v1322_v38 = vmul.f32 %v3701_v57, %v3632_v51 }
 0x36d   :  { %v1389_v1 = vmax.f32 %v1357_v54, 0.0  ;;  %v1392_v8 = vmax.f32 %v1360_v18, 0.0  ;;  %v1359_v13 = vadd.f32 %v3692_v46, %v1315_v58  ;;  %v1361_v39 = vadd.f32 %v3692_v46, %v1317_v5 }
 0x36e   :  { %v1394_v35 = vmax.f32 %v1362_v36, 0.0  ;;  %v1364_v14 = vadd.f32 %v3695_v9, %v1320_v43  ;;  %v1366_v29 = vadd.f32 %v3695_v9, %v1322_v38  ;;  %v1319_v11 = vmul.f32 %v3698_v2, %v3556_v41 }
 0x36f   :  { %v1415_v7 = vpack.c.bf16 %v1389_v1, %v1387_v20  ;;  %v1391_v22 = vmax.f32 %v1359_v13, 0.0  ;;  %v1393_v32 = vmax.f32 %v1361_v39, 0.0  ;;  %v1321_v51 = vmul.f32 %v3698_v2, %v3566_v19 }
 0x370   :  { %v1418_v63 = vpack.c.bf16 %v1394_v35, %v1392_v8  ;;  %v1396_v27 = vmax.f32 %v1364_v14, 0.0  ;;  %v1398_v42 = vmax.f32 %v1366_v29, 0.0  ;;  %v1324_v31 = vmul.f32 %v3701_v57, %v3644_v44 }
 0x371   :  { %v1326_v53 = vmul.f32 %v3701_v57, %v3652_v26  ;;  %v1417_v56 = vpack.c.bf16 %v1393_v32, %v1391_v22  ;;  %v1363_v12 = vadd.f32 %v3692_v46, %v1319_v11  ;;  %v1365_v47 = vadd.f32 %v3692_v46, %v1321_v51 }
 0x372   :  { %1662 = vmatmul.mubr.bf16.gmra.mxu0 %v1413_v30  ;;  %v1420_v40 = vpack.c.bf16 %v1398_v42, %v1396_v27  ;;  %v1368_v52 = vadd.f32 %v3695_v9, %v1324_v31  ;;  %v1323_v44 = vmul.f32 %v3698_v2, %v3578_v25  ;;  %v1325_v26 = vmul.f32 %v3698_v2, %v3590_v34 }
 0x373   :  { %1671 = vmatprep.mubr.bf16.mxu0 %v1416_v16  ;;  %v1370_v41 = vadd.f32 %v3695_v9, %v1326_v53  ;;  %v1395_v19 = vmax.f32 %v1363_v12, 0.0  ;;  %v1397_v21 = vmax.f32 %v1365_v47, 0.0  ;;  %v1328_v28 = vmul.f32 %v3701_v57, %v3660_v49  ;;  %v2649_v53 = vld [vmem:[#allocation14 + $0x78] sm:$0xff]  }
 0x374   :  { %v1400_v61 = vmax.f32 %v1368_v52, 0.0  ;;  %v1330_v0 = vmul.f32 %v3701_v57, %v3666_v48  ;;  %v1367_v62 = vadd.f32 %v3692_v46, %v1323_v44  ;;  %v1369_v3 = vadd.f32 %v3692_v46, %v1325_v26  ;;  %v2650_v12 = vld [vmem:[#allocation14 + $0x38] sm:$0xff]   ;;  %2425 = vmatprep.subr.bf16.mxu1 %v2649_v53  ;;  %v2653_v44 = vld [vmem:[#allocation14 + $0x68] sm:$0xff]   ;;  %v2664_v53 = vld [vmem:[#allocation14] sm:$0xff]  }
 0x375   :  { %v1402_v60 = vmax.f32 %v1370_v41, 0.0  ;;  %v1419_v45 = vpack.c.bf16 %v1397_v21, %v1395_v19  ;;  %v1372_v59 = vadd.f32 %v3695_v9, %v1328_v28  ;;  %v1327_v49 = vmul.f32 %v3698_v2, %v3602_v33  ;;  %2426 = vmatpush3.bf16.msra.mxu1 %v2650_v12  ;;  %v2652_v41 = vld [vmem:[#allocation14 + $0x30] sm:$0xff]  }
 0x376   :  { %v1374_v25 = vadd.f32 %v3695_v9, %v1330_v0  ;;  %v1399_v34 = vmax.f32 %v1367_v62, 0.0  ;;  %v1401_v30 = vmax.f32 %v1369_v3, 0.0  ;;  %v1329_v48 = vmul.f32 %v3698_v2, %v3614_v4  ;;  %v2655_v3 = vld [vmem:[#allocation14 + $0x60] sm:$0xff]  }
 0x377   :  { %v1422_v6 = vpack.c.bf16 %v1402_v60, %v1400_v61  ;;  %v1334_v50 = vmul.f32 %v3701_v57, %v3678_v17  ;;  %v1404_v54 = vmax.f32 %v1372_v59, 0.0  ;;  %v1332_v18 = vmul.f32 %v3701_v57, %v3672_v55  ;;  %v2654_v61 = vld [vmem:[#allocation14 + $0x28] sm:$0xff]   ;;  %v2656_v59 = vld [vmem:[#allocation14 + $0x20] sm:$0xff]  }
 0x378   :  { %v1406_v16 = vmax.f32 %v1374_v25, 0.0  ;;  %v1421_v36 = vpack.c.bf16 %v1401_v30, %v1399_v34  ;;  %v1371_v20 = vadd.f32 %v3692_v46, %v1327_v49  ;;  %v1373_v1 = vadd.f32 %v3692_v46, %v1329_v48 }
 0x379   :  { %v1378_v58 = vadd.f32 %v3695_v9, %v1334_v50  ;;  %v1376_v33 = vadd.f32 %v3695_v9, %v1332_v18  ;;  %v1331_v17 = vmul.f32 %v3698_v2, %v3626_v37  ;;  %v1333_v55 = vmul.f32 %v3698_v2, %v3638_v15  ;;  %v2657_v50 = vld [vmem:[#allocation14 + $0x58] sm:$0xff]   ;;  %v2659_v18 = vld [vmem:[#allocation14 + $0x50] sm:$0xff]  }
 0x37a   :  { %1672 = vmatmul.mubr.bf16.gmra.mxu0 %v1415_v7  ;;  %v1424_v5 = vpack.c.bf16 %v1406_v16, %v1404_v54  ;;  %v1403_v4 = vmax.f32 %v1371_v20, 0.0  ;;  %v1405_v8 = vmax.f32 %v1373_v1, 0.0  ;;  %v2658_v16 = vld [vmem:[#allocation14 + $0x18] sm:$0xff]  }
 0x37b   :  { %1681 = vmatprep.mubr.bf16.mxu0 %v1418_v63  ;;  %v1408_v57 = vmax.f32 %v1376_v33, 0.0  ;;  %v1410_v35 = vmax.f32 %v1378_v58, 0.0  ;;  %v1375_v38 = vadd.f32 %v3692_v46, %v1331_v17  ;;  %v1377_v7 = vadd.f32 %v3692_v46, %v1333_v55  ;;  %v2660_v58 = vld [vmem:[#allocation14 + $0x10] sm:$0xff]  }
 0x37c   :  { %v1423_v43 = vpack.c.bf16 %v1405_v8, %v1403_v4  ;;  %v2661_v4 = vld [vmem:[#allocation14 + $0x48] sm:$0xff]  }
 0x37d   :  { %v1426_v13 = vpack.c.bf16 %v1410_v35, %v1408_v57  ;;  %v1407_v9 = vmax.f32 %v1375_v38, 0.0  ;;  %v1409_v39 = vmax.f32 %v1377_v7, 0.0  ;;  %v2662_v35 = vld [vmem:[#allocation14 + $0x8] sm:$0xff]   ;;  %v2663_v7 = vld [vmem:[#allocation14 + $0x40] sm:$0xff]  }
 0x37f   :  { %v1425_v63 = vpack.c.bf16 %v1409_v39, %v1407_v9 }
 0x382   :  { %1682 = vmatmul.mubr.bf16.gmra.mxu0 %v1417_v56 }
 0x383   :  { %1691 = vmatprep.mubr.bf16.mxu0 %v1420_v40  ;;  %v2651_v40 = vld [vmem:[#allocation14 + $0x70] sm:$0xff]  }
 0x384   :  { %2427 = vmatprep.subr.bf16.mxu1 %v2651_v40 }
 0x385   :  { %2428 = vmatpush3.bf16.msra.mxu1 %v2652_v41 }
 0x386   :  { %2429 = vmatprep.subr.bf16.mxu1 %v2653_v44 }
 0x389   :  { %2430 = vmatpush3.bf16.msra.mxu1 %v2654_v61 }
 0x38a   :  { %1692 = vmatmul.mubr.bf16.gmra.mxu0 %v1419_v45  ;;  %2431 = vmatprep.subr.bf16.mxu1 %v2655_v3 }
 0x38b   :  { %1701 = vmatprep.mubr.bf16.mxu0 %v1422_v6 }
 0x38d   :  { %2432 = vmatpush3.bf16.msra.mxu1 %v2656_v59 }
 0x38e   :  { %2433 = vmatprep.subr.bf16.mxu1 %v2657_v50 }
 0x391   :  { %2434 = vmatpush3.bf16.msra.mxu1 %v2658_v16 }
 0x392   :  { %1702 = vmatmul.mubr.bf16.gmra.mxu0 %v1421_v36  ;;  %2435 = vmatprep.subr.bf16.mxu1 %v2659_v18 }
 0x393   :  { %1711 = vmatprep.mubr.bf16.mxu0 %v1424_v5 }
 0x395   :  { %2436 = vmatpush3.bf16.msra.mxu1 %v2660_v58 }
 0x396   :  { %2437 = vmatprep.subr.bf16.mxu1 %v2661_v4 }
 0x399   :  { %2438 = vmatpush3.bf16.msra.mxu1 %v2662_v35 }
 0x39a   :  { %1712 = vmatmul.mubr.bf16.gmra.mxu0 %v1423_v43  ;;  %2439 = vmatprep.subr.bf16.mxu1 %v2663_v7 }
 0x39b   :  { %1721 = vmatprep.mubr.bf16.mxu0 %v1426_v13 }
 0x39d   :  { %2440 = vmatpush3.bf16.msra.mxu1 %v2664_v53 }
 0x3a2   :  { %1722 = vmatmul.mubr.bf16.gmra.mxu0 %v1425_v63 }
 0x42a   :  { %v3799_v14 = vpop.f32.mrf.mxu0 }
 0x42c   :  { %v3801_v37 = vpop.f32.mrf.mxu0 }
 0x42e   :  { %v3803_v29 = vpop.f32.mrf.mxu0 }
 0x42f   :  { %v1732_v21 = vadd.f32 %v3803_v29, %v3799_v14 }
 0x430   :  { %v3805_v15 = vpop.f32.mrf.mxu0 }
 0x431   :  { %v1753_v60 = vadd.f32 %v3805_v15, %v3801_v37 }
 0x432   :  { %v3807_v2 = vpop.f32.mrf.mxu0 }
 0x433   :  { %v1733_v28 = vadd.f32 %v1732_v21, %v3807_v2 }
 0x434   :  { %v3809_v22 = vpop.f32.mrf.mxu0 }
 0x435   :  { %v1754_v45 = vadd.f32 %v1753_v60, %v3809_v22 }
 0x436   :  { %v3811_v46 = vpop.f32.mrf.mxu0 }
 0x437   :  { %v1734_v62 = vadd.f32 %v1733_v28, %v3811_v46 }
 0x438   :  { %v3813_v32 = vpop.f32.mrf.mxu0 }
 0x439   :  { %v1755_v25 = vadd.f32 %v1754_v45, %v3813_v32 }
 0x43a   :  { %v3815_v11 = vpop.f32.mrf.mxu0 }
 0x43b   :  { %v1735_v34 = vadd.f32 %v1734_v62, %v3815_v11 }
 0x43c   :  { %v3817_v51 = vpop.f32.mrf.mxu0 }
 0x43d   :  { %v1756_v49 = vadd.f32 %v1755_v25, %v3817_v51 }
 0x43e   :  { %v3819_v27 = vpop.f32.mrf.mxu0 }
 0x43f   :  { %v1736_v48 = vadd.f32 %v1735_v34, %v3819_v27 }
 0x440   :  { %v3821_v42 = vpop.f32.mrf.mxu0 }
 0x441   :  { %v1757_v36 = vadd.f32 %v1756_v49, %v3821_v42 }
 0x442   :  { %v3823_v31 = vpop.f32.mrf.mxu0 }
 0x443   :  { %v1737_v20 = vadd.f32 %v1736_v48, %v3823_v31 }
 0x444   :  { %v3825_v56 = vpop.f32.mrf.mxu0 }
 0x445   :  { %v1758_v5 = vadd.f32 %v1757_v36, %v3825_v56 }
 0x446   :  { %v3827_v47 = vpop.f32.mrf.mxu0 }
 0x447   :  { %v1738_v33 = vadd.f32 %v1737_v20, %v3827_v47 }
 0x448   :  { %v3829_v52 = vpop.f32.mrf.mxu0 }
 0x449   :  { %v1759_v17 = vadd.f32 %v1758_v5, %v3829_v52 }
 0x44a   :  { %v3831_v19 = vpop.f32.mrf.mxu0 }
 0x44b   :  { %v1739_v55 = vadd.f32 %v1738_v33, %v3831_v19 }
 0x44c   :  { %v3835_v26 = vpop.f32.mrf.mxu0 }
 0x44d   :  { %v1760_v43 = vadd.f32 %v1759_v17, %v3835_v26 }
 0x44e   :  { %v3840_v0 = vpop.f32.mrf.mxu0 }
 0x44f   :  { %v1740_v38 = vadd.f32 %v1739_v55, %v3840_v0 }
 0x450   :  { %v3844_v6 = vpop.f32.mrf.mxu0 }
 0x451   :  { %v1761_v9 = vadd.f32 %v1760_v43, %v3844_v6 }
 0x452   :  { %v3848_v30 = vpop.f32.mrf.mxu0 }
 0x453   :  { %v1741_v39 = vadd.f32 %v1740_v38, %v3848_v30 }
 0x454   :  { %v3852_v54 = vpop.f32.mrf.mxu0 }
 0x455   :  { %v1762_v12 = vadd.f32 %v1761_v9, %v3852_v54 }
 0x456   :  { %v3856_v1 = vpop.f32.mrf.mxu0 }
 0x457   :  { %v1742_v40 = vadd.f32 %v1741_v39, %v3856_v1 }
 0x458   :  { %v3860_v8 = vpop.f32.mrf.mxu0 }
 0x459   :  { %v1763_v21 = vadd.f32 %v1762_v12, %v3860_v8 }
 0x45a   :  { %v3864_v57 = vpop.f32.mrf.mxu0 }
 0x45b   :  { %v1743_v44 = vadd.f32 %v1742_v40, %v3864_v57 }
 0x45c   :  { %v3868_v13 = vpop.f32.mrf.mxu0 }
 0x45d   :  { %v1764_v60 = vadd.f32 %v1763_v21, %v3868_v13 }
 0x45e   :  { %v3872_v63 = vpop.f32.mrf.mxu0 }
 0x45f   :  { %v1744_v28 = vadd.f32 %v1743_v44, %v3872_v63 }
 0x460   :  { %v3876_v41 = vpop.f32.mrf.mxu0 }
 0x461   :  { %v1765_v62 = vadd.f32 %v1764_v60, %v3876_v41 }
 0x462   :  { %v3880_v61 = vpop.f32.mrf.mxu0 }
 0x463   :  { %v1745_v3 = vadd.f32 %v1744_v28, %v3880_v61 }
 0x464   :  { %v3884_v45 = vpop.f32.mrf.mxu0 }
 0x465   :  { %v1766_v25 = vadd.f32 %v1765_v62, %v3884_v45 }
 0x466   :  { %v3888_v59 = vpop.f32.mrf.mxu0 }
 0x467   :  { %v1746_v34 = vadd.f32 %v1745_v3, %v3888_v59 }
 0x468   :  { %v3892_v49 = vpop.f32.mrf.mxu0 }
 0x469   :  { %v1747_v48 = vrot.slane %v1746_v34, 4  ;;  %v1767_v50 = vadd.f32 %v1766_v25, %v3892_v49 }
 0x46b   :  { %v1748_v16 = vadd.f32 %v1747_v48, %v1746_v34  ;;  %v1768_v18 = vrot.slane %v1767_v50, 4 }
 0x46d   :  { %v1749_v36 = vrot.slane %v1748_v16, 2  ;;  %v1769_v20 = vadd.f32 %v1768_v18, %v1767_v50 }
 0x46f   :  { %v1750_v58 = vadd.f32 %v1749_v36, %v1748_v16  ;;  %v1770_v5 = vrot.slane %v1769_v20, 2 }
 0x471   :  { %v1751_v33 = vrot.slane %v1750_v58, 1  ;;  %v1771_v17 = vadd.f32 %v1770_v5, %v1769_v20 }
 0x473   :  { %v1752_v4 = vadd.f32 %v1751_v33, %v1750_v58  ;;  %v1772_v38 = vrot.slane %v1771_v17, 1 }
 0x475   :  { %v3895_v55 = vmul.f32 0.0078125, %v1752_v4  ;;  %v1773_v53 = vadd.f32 %v1772_v38, %v1771_v17 }
 0x477   :  { %v3899_v35 = vsub.f32 %v3799_v14, %v3895_v55  ;;  %v3903_v43 = vsub.f32 %v3803_v29, %v3895_v55  ;;  %v3907_v7 = vsub.f32 %v3807_v2, %v3895_v55  ;;  %v3915_v14 = vsub.f32 %v3811_v46, %v3895_v55 }
 0x478   :  { %v3919_v29 = vsub.f32 %v3815_v11, %v3895_v55  ;;  %v3923_v40 = vmul.f32 0.0078125, %v1773_v53  ;;  %v3927_v21 = vsub.f32 %v3819_v27, %v3895_v55  ;;  %v3941_v28 = vsub.f32 %v3823_v31, %v3895_v55 }
 0x479   :  { %v1808_v9 = vmul.f32 %v3899_v35, %v3899_v35  ;;  %v1810_v39 = vmul.f32 %v3903_v43, %v3903_v43  ;;  %v1812_v12 = vmul.f32 %v3907_v7, %v3907_v7  ;;  %v1814_v44 = vmul.f32 %v3915_v14, %v3915_v14 }
 0x47a   :  { %v3933_v46 = vsub.f32 %v3801_v37, %v3923_v40  ;;  %v3937_v11 = vsub.f32 %v3805_v15, %v3923_v40  ;;  %v1816_v27 = vmul.f32 %v3919_v29, %v3919_v29  ;;  %v3947_v3 = vsub.f32 %v3827_v47, %v3895_v55 }
 0x47b   :  { %v1840_v2 = vadd.f32 %v1810_v39, %v1808_v9  ;;  %v1818_v37 = vmul.f32 %v3927_v21, %v3927_v21  ;;  %v3953_v15 = vsub.f32 %v3809_v22, %v3923_v40  ;;  %v3961_v48 = vsub.f32 %v3831_v19, %v3895_v55 }
 0x47c   :  { %v1809_v31 = vmul.f32 %v3933_v46, %v3933_v46  ;;  %v1811_v34 = vmul.f32 %v3937_v11, %v3937_v11  ;;  %v1820_v47 = vmul.f32 %v3941_v28, %v3941_v28  ;;  %v3967_v16 = vsub.f32 %v3813_v32, %v3923_v40 }
 0x47d   :  { %v1841_v60 = vadd.f32 %v1840_v2, %v1812_v12  ;;  %v3971_v22 = vsub.f32 %v3840_v0, %v3895_v55  ;;  %v1822_v18 = vmul.f32 %v3947_v3, %v3947_v3  ;;  %v3977_v19 = vsub.f32 %v3817_v51, %v3923_v40 }
 0x47e   :  { %v1813_v20 = vmul.f32 %v3953_v15, %v3953_v15  ;;  %v1861_v58 = vadd.f32 %v1811_v34, %v1809_v31  ;;  %v3983_v32 = vsub.f32 %v3848_v30, %v3895_v55  ;;  %v1824_v0 = vmul.f32 %v3961_v48, %v3961_v48 }
 0x47f   :  { %v1842_v62 = vadd.f32 %v1841_v60, %v1814_v44  ;;  %v3989_v33 = vsub.f32 %v3821_v42, %v3923_v40  ;;  %v1815_v51 = vmul.f32 %v3967_v16, %v3967_v16  ;;  %v3995_v17 = vsub.f32 %v3856_v1, %v3895_v55 }
 0x480   :  { %v1862_v4 = vadd.f32 %v1861_v58, %v1813_v20  ;;  %v1826_v30 = vmul.f32 %v3971_v22, %v3971_v22  ;;  %v4001_v9 = vsub.f32 %v3825_v56, %v3923_v40  ;;  %v1817_v42 = vmul.f32 %v3977_v19, %v3977_v19 }
 0x481   :  { %v1843_v25 = vadd.f32 %v1842_v62, %v1816_v27  ;;  %v4007_v53 = vsub.f32 %v3864_v57, %v3895_v55  ;;  %v1828_v1 = vmul.f32 %v3983_v32, %v3983_v32  ;;  %v4013_v2 = vsub.f32 %v3829_v52, %v3923_v40 }
 0x482   :  { %v1863_v39 = vadd.f32 %v1862_v4, %v1815_v51  ;;  %v1819_v56 = vmul.f32 %v3989_v33, %v3989_v33  ;;  %v4019_v60 = vsub.f32 %v3872_v63, %v3895_v55  ;;  %v1830_v57 = vmul.f32 %v3995_v17, %v3995_v17 }
 0x483   :  { %v1844_v50 = vadd.f32 %v1843_v25, %v1818_v37  ;;  %v4025_v62 = vsub.f32 %v3835_v26, %v3923_v40  ;;  %v1821_v52 = vmul.f32 %v4001_v9, %v4001_v9  ;;  %v4031_v25 = vsub.f32 %v3880_v61, %v3895_v55 }
 0x484   :  { %v1864_v44 = vadd.f32 %v1863_v39, %v1817_v42  ;;  %v1832_v63 = vmul.f32 %v4007_v53, %v4007_v53  ;;  %v4037_v34 = vsub.f32 %v3844_v6, %v3923_v40  ;;  %v1823_v26 = vmul.f32 %v4013_v2, %v4013_v2 }
 0x485   :  { %v1845_v36 = vadd.f32 %v1844_v50, %v1820_v47  ;;  %v4043_v50 = vsub.f32 %v3888_v59, %v3895_v55  ;;  %v1834_v61 = vmul.f32 %v4019_v60, %v4019_v60  ;;  %v1825_v6 = vmul.f32 %v4025_v62, %v4025_v62 }
 0x486   :  { %v1865_v37 = vadd.f32 %v1864_v44, %v1819_v56  ;;  %v1836_v58 = vmul.f32 %v4031_v25, %v4031_v25  ;;  %v4057_v59 = vsub.f32 %v3860_v8, %v3923_v40  ;;  %v1827_v55 = vmul.f32 %v4037_v34, %v4037_v34 }
 0x487   :  { %v1846_v5 = vadd.f32 %v1845_v36, %v1822_v18  ;;  %v4049_v36 = vsub.f32 %v3852_v54, %v3923_v40  ;;  %v1838_v54 = vmul.f32 %v4043_v50, %v4043_v50  ;;  %v4065_v4 = vsub.f32 %v3868_v13, %v3923_v40 }
 0x488   :  { %v1866_v47 = vadd.f32 %v1865_v37, %v1821_v52  ;;  %v4071_v8 = vsub.f32 %v3876_v41, %v3923_v40  ;;  %v1831_v39 = vmul.f32 %v4057_v59, %v4057_v59  ;;  %v4077_v56 = vsub.f32 %v3884_v45, %v3923_v40 }
 0x489   :  { %v1847_v38 = vadd.f32 %v1846_v5, %v1824_v0  ;;  %v1833_v13 = vmul.f32 %v4065_v4, %v4065_v4 }
 0x48a   :  { %v1867_v20 = vadd.f32 %v1866_v47, %v1823_v26  ;;  %v1835_v41 = vmul.f32 %v4071_v8, %v4071_v8 }
 0x48b   :  { %v1848_v12 = vadd.f32 %v1847_v38, %v1826_v30  ;;  %v1829_v30 = vmul.f32 %v4049_v36, %v4049_v36 }
 0x48c   :  { %v1868_v5 = vadd.f32 %v1867_v20, %v1825_v6 }
 0x48d   :  { %v1849_v27 = vadd.f32 %v1848_v12, %v1828_v1 }
 0x48e   :  { %v1869_v38 = vadd.f32 %v1868_v5, %v1827_v55 }
 0x48f   :  { %v1850_v31 = vadd.f32 %v1849_v27, %v1830_v57  ;;  %v4083_v27 = vsub.f32 %v3892_v49, %v3923_v40 }
 0x490   :  { %v1870_v1 = vadd.f32 %v1869_v38, %v1829_v30 }
 0x491   :  { %v1851_v18 = vadd.f32 %v1850_v31, %v1832_v63  ;;  %v1837_v63 = vmul.f32 %v4077_v56, %v4077_v56  ;;  %v1839_v26 = vmul.f32 %v4083_v27, %v4083_v27 }
 0x492   :  { %v1871_v44 = vadd.f32 %v1870_v1, %v1831_v39 }
 0x493   :  { %v1852_v0 = vadd.f32 %v1851_v18, %v1834_v61 }
 0x494   :  { %v1872_v52 = vadd.f32 %v1871_v44, %v1833_v13  ;;  %v1951_v44 = vld [vmem:[#allocation13] sm:$0x3] }
 0x495   :  { %v1853_v51 = vadd.f32 %v1852_v0, %v1836_v58 }
 0x496   :  { %v1873_v31 = vadd.f32 %v1872_v52, %v1835_v41  ;;  %v4097_v41 = vrot.slane %v1951_v44, %v3282_v24  ;;  %v4100_v52 = vrot.slane %v1951_v44, %v3284_v23 }
 0x497   :  { %v1854_v42 = vadd.f32 %v1853_v51, %v1838_v54 }
 0x498   :  { %v1874_v47 = vadd.f32 %v1873_v31, %v1837_v63 }
 0x499   :  { %v1855_v12 = vrot.slane %v1854_v42, 4 }
 0x49a   :  { %v1875_v61 = vadd.f32 %v1874_v47, %v1839_v26 }
 0x49b   :  { %v1856_v57 = vadd.f32 %v1855_v12, %v1854_v42  ;;  %v1884_v12 = vld [vmem:[%s4239_s8] sm:$0x3] }
 0x49c   :  { %v1876_v6 = vrot.slane %v1875_v61, 4 }
 0x49d   :  { %v1857_v37 = vrot.slane %v1856_v57, 2 }
 0x49e   :  { %v1877_v20 = vadd.f32 %v1876_v6, %v1875_v61 }
 0x49f   :  { %v1858_v45 = vadd.f32 %v1857_v37, %v1856_v57 }
 0x4a0   :  { %v1878_v40 = vrot.slane %v1877_v20, 2 }
 0x4a1   :  { %v1859_v18 = vrot.slane %v1858_v45, 1 }
 0x4a2   :  { %v1879_v58 = vadd.f32 %v1878_v40, %v1877_v20 }
 0x4a3   :  { %v1860_v49 = vadd.f32 %v1859_v18, %v1858_v45 }
 0x4a4   :  { %v1880_v55 = vrot.slane %v1879_v58, 1 }
 0x4a5   :  { %v1882_v0 = vmul.f32 0.0078125, %v1860_v49 }
 0x4a6   :  { %v1881_v5 = vadd.f32 %v1880_v55, %v1879_v58 }
 0x4a7   :  { %v1885_v54 = vadd.f32 1e-05, %v1882_v0 }
 0x4a8   :  { %v1883_v51 = vmul.f32 0.0078125, %v1881_v5 }
 0x4a9   :  { %2673 = vrsqrt.f32 %v1885_v54 }
 0x4aa   :  { %v1886_v30 = vadd.f32 1e-05, %v1883_v51 }
 0x4ac   :  { %2675 = vrsqrt.f32 %v1886_v30 }
 0x4b6   :  { %v2674_v38 = vpop.eup %2673 }
 0x4b9   :  { %v2676_v42 = vpop.eup %2675 }
 0x4ba   :  { %v1891_v39 = vcombine.low %v2674_v38, %v2676_v42 }
 0x4bc   :  { %v1898_v1 = vrot.slane %v1891_v39, %v3275_v10 }
 0x4be   :  { %v1905_v13 = vrot.slane %v1898_v1, %v3275_v10 }
 0x4c0   :  { %v1907_v57 = vmul.f32 %v1905_v13, %v1884_v12 }
 0x4c2   :  { %v4103_v37 = vrot.slane %v1907_v57, %v3282_v24  ;;  %v4106_v63 = vrot.slane %v1907_v57, %v3284_v23 }
 0x4c4   :  { %v1920_v31 = vmul.f32 %v4106_v63, %v3933_v46  ;;  %v1922_v10 = vmul.f32 %v4106_v63, %v3937_v11  ;;  %v1919_v45 = vmul.f32 %v4103_v37, %v3899_v35  ;;  %v1921_v26 = vmul.f32 %v4103_v37, %v3903_v43 }
 0x4c5   :  { %v1924_v47 = vmul.f32 %v4106_v63, %v3953_v15  ;;  %v1926_v24 = vmul.f32 %v4106_v63, %v3967_v16  ;;  %v1923_v11 = vmul.f32 %v4103_v37, %v3907_v7  ;;  %v1925_v15 = vmul.f32 %v4103_v37, %v3915_v14 }
 0x4c6   :  { %v1964_v23 = vadd.f32 %v4100_v52, %v1920_v31  ;;  %v1966_v61 = vadd.f32 %v4100_v52, %v1922_v10  ;;  %v1963_v46 = vadd.f32 %v4097_v41, %v1919_v45  ;;  %v1965_v35 = vadd.f32 %v4097_v41, %v1921_v26 }
 0x4c7   :  { %v1968_v18 = vadd.f32 %v4100_v52, %v1924_v47  ;;  %v1970_v43 = vadd.f32 %v4100_v52, %v1926_v24  ;;  %v1928_v55 = vmul.f32 %v4106_v63, %v3977_v19  ;;  %v1930_v7 = vmul.f32 %v4106_v63, %v3989_v33 }
 0x4c8   :  { %v1996_v6 = vmax.f32 %v1964_v23, 0.0  ;;  %v1998_v16 = vmax.f32 %v1966_v61, 0.0  ;;  %v1995_v20 = vmax.f32 %v1963_v46, 0.0  ;;  %v1997_v49 = vmax.f32 %v1965_v35, 0.0 }
 0x4c9   :  { %v2000_v40 = vmax.f32 %v1968_v18, 0.0  ;;  %v2002_v58 = vmax.f32 %v1970_v43, 0.0  ;;  %v1967_v54 = vadd.f32 %v4097_v41, %v1923_v11  ;;  %v1969_v51 = vadd.f32 %v4097_v41, %v1925_v15 }
 0x4ca   :  { %v2028_v0 = vpack.c.bf16 %v1998_v16, %v1996_v6  ;;  %v2027_v5 = vpack.c.bf16 %v1997_v49, %v1995_v20  ;;  %v1972_v30 = vadd.f32 %v4100_v52, %v1928_v55  ;;  %v1974_v38 = vadd.f32 %v4100_v52, %v1930_v7 }
 0x4cb   :  { %v2030_v14 = vpack.c.bf16 %v2002_v58, %v2000_v40  ;;  %v1999_v42 = vmax.f32 %v1967_v54, 0.0  ;;  %v2001_v39 = vmax.f32 %v1969_v51, 0.0  ;;  %v1927_v19 = vmul.f32 %v4103_v37, %v3919_v29 }
 0x4cc   :  { %2210 = vmatprep.mubr.bf16.mxu1 %v2028_v0  ;;  %v1929_v33 = vmul.f32 %v4103_v37, %v3927_v21  ;;  %v2004_v1 = vmax.f32 %v1972_v30, 0.0  ;;  %v2006_v12 = vmax.f32 %v1974_v38, 0.0  ;;  %v1932_v13 = vmul.f32 %v4106_v63, %v4001_v9 }
 0x4cd   :  { %2211 = vmatmul.mubr.bf16.vlgmr.msra.gmra.mxu1 %v2027_v5  ;;  %v1934_v44 = vmul.f32 %v4106_v63, %v4013_v2  ;;  %v2029_v57 = vpack.c.bf16 %v2001_v39, %v1999_v42  ;;  %v1971_v31 = vadd.f32 %v4097_v41, %v1927_v19  ;;  %v1931_v9 = vmul.f32 %v4103_v37, %v3941_v28 }
 0x4ce   :  { %2218 = vmatprep.mubr.bf16.mxu1 %v2030_v14  ;;  %v1973_v10 = vadd.f32 %v4097_v41, %v1929_v33  ;;  %v2032_v45 = vpack.c.bf16 %v2006_v12, %v2004_v1  ;;  %v1976_v26 = vadd.f32 %v4100_v52, %v1932_v13  ;;  %v1933_v2 = vmul.f32 %v4103_v37, %v3947_v3 }
 0x4cf   :  { %v1978_v29 = vadd.f32 %v4100_v52, %v1934_v44  ;;  %v2003_v21 = vmax.f32 %v1971_v31, 0.0  ;;  %v1936_v61 = vmul.f32 %v4106_v63, %v4025_v62  ;;  %v1938_v46 = vmul.f32 %v4106_v63, %v4037_v34 }
 0x4d0   :  { %v2005_v47 = vmax.f32 %v1973_v10, 0.0  ;;  %v2008_v24 = vmax.f32 %v1976_v26, 0.0  ;;  %v1975_v35 = vadd.f32 %v4097_v41, %v1931_v9  ;;  %v1977_v18 = vadd.f32 %v4097_v41, %v1933_v2 }
 0x4d1   :  { %v2010_v23 = vmax.f32 %v1978_v29, 0.0  ;;  %v1980_v15 = vadd.f32 %v4100_v52, %v1936_v61  ;;  %v1982_v28 = vadd.f32 %v4100_v52, %v1938_v46  ;;  %v1935_v62 = vmul.f32 %v4103_v37, %v3961_v48 }
 0x4d2   :  { %v2031_v11 = vpack.c.bf16 %v2005_v47, %v2003_v21  ;;  %v2007_v3 = vmax.f32 %v1975_v35, 0.0  ;;  %v2009_v6 = vmax.f32 %v1977_v18, 0.0  ;;  %v1937_v34 = vmul.f32 %v4103_v37, %v3971_v22 }
 0x4d3   :  { %v2034_v43 = vpack.c.bf16 %v2010_v23, %v2008_v24  ;;  %v2012_v16 = vmax.f32 %v1980_v15, 0.0  ;;  %v2014_v20 = vmax.f32 %v1982_v28, 0.0  ;;  %v1940_v49 = vmul.f32 %v4106_v63, %v4049_v36 }
 0x4d4   :  { %v1942_v40 = vmul.f32 %v4106_v63, %v4057_v59  ;;  %v2033_v58 = vpack.c.bf16 %v2009_v6, %v2007_v3  ;;  %v1979_v0 = vadd.f32 %v4097_v41, %v1935_v62  ;;  %v1981_v55 = vadd.f32 %v4097_v41, %v1937_v34 }
 0x4d5   :  { %2219 = vmatmul.mubr.bf16.gmra.mxu1 %v2029_v57  ;;  %v2036_v7 = vpack.c.bf16 %v2014_v20, %v2012_v16  ;;  %v1984_v5 = vadd.f32 %v4100_v52, %v1940_v49  ;;  %v1939_v36 = vmul.f32 %v4103_v37, %v3983_v32  ;;  %v1941_v59 = vmul.f32 %v4103_v37, %v3995_v17 }
 0x4d6   :  { %2226 = vmatprep.mubr.bf16.mxu1 %v2032_v45  ;;  %v1986_v48 = vadd.f32 %v4100_v52, %v1942_v40  ;;  %v2011_v22 = vmax.f32 %v1979_v0, 0.0  ;;  %v2013_v54 = vmax.f32 %v1981_v55, 0.0  ;;  %v1944_v30 = vmul.f32 %v4106_v63, %v4065_v4 }
 0x4d7   :  { %v2016_v51 = vmax.f32 %v1984_v5, 0.0  ;;  %v1946_v38 = vmul.f32 %v4106_v63, %v4071_v8  ;;  %v1983_v39 = vadd.f32 %v4097_v41, %v1939_v36  ;;  %v1985_v19 = vadd.f32 %v4097_v41, %v1941_v59 }
 0x4d8   :  { %v2018_v14 = vmax.f32 %v1986_v48, 0.0  ;;  %v2035_v42 = vpack.c.bf16 %v2013_v54, %v2011_v22  ;;  %v1988_v1 = vadd.f32 %v4100_v52, %v1944_v30  ;;  %v1943_v4 = vmul.f32 %v4103_v37, %v4007_v53 }
 0x4d9   :  { %v1990_v32 = vadd.f32 %v4100_v52, %v1946_v38  ;;  %v2015_v17 = vmax.f32 %v1983_v39, 0.0  ;;  %v2017_v12 = vmax.f32 %v1985_v19, 0.0  ;;  %v1945_v8 = vmul.f32 %v4103_v37, %v4019_v60 }
 0x4da   :  { %v2038_v33 = vpack.c.bf16 %v2018_v14, %v2016_v51  ;;  %v1950_v13 = vmul.f32 %v4106_v63, %v4083_v27  ;;  %v2020_v44 = vmax.f32 %v1988_v1, 0.0  ;;  %v1948_v31 = vmul.f32 %v4106_v63, %v4077_v56 }
 0x4db   :  { %v2022_v57 = vmax.f32 %v1990_v32, 0.0  ;;  %v2037_v10 = vpack.c.bf16 %v2017_v12, %v2015_v17  ;;  %v1987_v45 = vadd.f32 %v4097_v41, %v1943_v4  ;;  %v1989_v26 = vadd.f32 %v4097_v41, %v1945_v8 }
 0x4dc   :  { %v1994_v29 = vadd.f32 %v4100_v52, %v1950_v13  ;;  %v1992_v53 = vadd.f32 %v4100_v52, %v1948_v31  ;;  %v1947_v27 = vmul.f32 %v4103_v37, %v4031_v25  ;;  %v1949_v56 = vmul.f32 %v4103_v37, %v4043_v50  ;;  %v4207_v25 = vld [vmem:[%s4242_s11] ss:$0 sm:$0xff]  ;;  %s2884_s11 = smov [#allocation16]  }
 0x4dd   :  { %2227 = vmatmul.mubr.bf16.gmra.mxu1 %v2031_v11  ;;  %v2040_v21 = vpack.c.bf16 %v2022_v57, %v2020_v44  ;;  %v2019_v60 = vmax.f32 %v1987_v45, 0.0  ;;  %v2021_v47 = vmax.f32 %v1989_v26, 0.0  ;;  %s2296_s7 = sshll.u32 %s2884_s11, 4  ;;  %s2297_s7 = int_to_ptr.vmem [resolvable:$true] %s2296_s7 }
 0x4de   :  { %2234 = vmatprep.mubr.bf16.mxu1 %v2034_v43  ;;  %v2026_v63 = vmax.f32 %v1994_v29, 0.0  ;;  %v2024_v9 = vmax.f32 %v1992_v53, 0.0  ;;  %v1991_v24 = vadd.f32 %v4097_v41, %v1947_v27  ;;  %v1993_v23 = vadd.f32 %v4097_v41, %v1949_v56  ;;  %s2837_s30 = scalar_lea.vmem %s2297_s7, 2048  ;;  %p2842_p13 = scmp.lt.s32.totalorder %s2297_s7, %s2297_s7 }
 0x4df   :  { %v2039_v2 = vpack.c.bf16 %v2021_v47, %v2019_v60  ;;  %p2838_p12 = scmp.ne.s32.totalorder %s2297_s7, %s2837_s30  ;;  %p2843_p0 = scmp.lt.s32.totalorder %s2837_s30, %s2837_s30 }
 0x4e0   :  { %v2042_v61 = vpack.c.bf16 %v2026_v63, %v2024_v9  ;;  %v2023_v52 = vmax.f32 %v1991_v24, 0.0  ;;  %v2025_v46 = vmax.f32 %v1993_v23, 0.0 }
 0x4e1   :  { %p2844_p1 = por %p2843_p0, %p2842_p13 }
 0x4e2   :  { %v2041_v11 = vpack.c.bf16 %v2025_v46, %v2023_v52 }
 0x4e3   :  { %p2845_p2 = pnand %p2844_p1, %p2838_p12 }
 0x4e5   :  { %2235 = vmatmul.mubr.bf16.gmra.mxu1 %v2033_v58 }
 0x4e6   :  { %2242 = vmatprep.mubr.bf16.mxu1 %v2036_v7 }
 0x4ed   :  { %2243 = vmatmul.mubr.bf16.gmra.mxu1 %v2035_v42 }
 0x4ee   :  { %2250 = vmatprep.mubr.bf16.mxu1 %v2038_v33 }
 0x4f5   :  { %2251 = vmatmul.mubr.bf16.gmra.mxu1 %v2037_v10 }
 0x4f6   :  { %2258 = vmatprep.mubr.bf16.mxu1 %v2040_v21 }
 0x4fd   :  { %2259 = vmatmul.mubr.bf16.gmra.mxu1 %v2039_v2 }
 0x4fe   :  { %2266 = vmatprep.mubr.bf16.mxu1 %v2042_v61 }
 0x505   :  { %2267 = vmatmul.mubr.bf16.gmra.mxu1 %v2041_v11 }
 0x58d   :  { %v2441_v35 = vpop.f32.mrf.mxu1 }
 0x58f   :  { %v2442_v50 = vpop.f32.mrf.mxu1 }
 0x590   :  { %v2443_v37 = vadd.f32 %v2442_v50, %v2441_v35 }
 0x591   :  { %v2444_v18 = vpop.f32.mrf.mxu1 }
 0x592   :  { %v2213_v43 = vadd.f32 %v2443_v37, %v4207_v25 }
 0x593   :  { %v2445_v15 = vpop.f32.mrf.mxu1 }
 0x594   :  { %2275 = vst [vmem:[#allocation16] sm:$0xff] %v2213_v43  ;;  %v2446_v41 = vadd.f32 %v2445_v15, %v2444_v18 }
 0x595   :  { %v2447_v28 = vpop.f32.mrf.mxu1 }
 0x596   :  { %v2216_v3 = vadd.f32 %v2446_v41, %v4207_v25 }
 0x597   :  { %v2448_v6 = vpop.f32.mrf.mxu1 }
 0x598   :  { %2276 = vst [vmem:[#allocation16 + $0x8] sm:$0xff] %v2216_v3  ;;  %v2449_v62 = vadd.f32 %v2448_v6, %v2447_v28 }
 0x599   :  { %v2450_v34 = vpop.f32.mrf.mxu1 }
 0x59a   :  { %v2221_v16 = vadd.f32 %v2449_v62, %v4207_v25 }
 0x59b   :  { %v2451_v20 = vpop.f32.mrf.mxu1 }
 0x59c   :  { %2277 = vst [vmem:[#allocation16 + $0x10] sm:$0xff] %v2221_v16  ;;  %v2452_v49 = vadd.f32 %v2451_v20, %v2450_v34 }
 0x59d   :  { %v2453_v40 = vpop.f32.mrf.mxu1 }
 0x59e   :  { %v2224_v58 = vadd.f32 %v2452_v49, %v4207_v25 }
 0x59f   :  { %v2454_v0 = vpop.f32.mrf.mxu1 }
 0x5a0   :  { %2278 = vst [vmem:[#allocation16 + $0x18] sm:$0xff] %v2224_v58  ;;  %v2455_v55 = vadd.f32 %v2454_v0, %v2453_v40 }
 0x5a1   :  { %v2456_v7 = vpop.f32.mrf.mxu1 }
 0x5a2   :  { %v2229_v5 = vadd.f32 %v2455_v55, %v4207_v25 }
 0x5a3   :  { %v2457_v48 = vpop.f32.mrf.mxu1 }
 0x5a4   :  { %2279 = vst [vmem:[#allocation16 + $0x20] sm:$0xff] %v2229_v5  ;;  %v2458_v22 = vadd.f32 %v2457_v48, %v2456_v7 }
 0x5a5   :  { %v2459_v54 = vpop.f32.mrf.mxu1 }
 0x5a6   :  { %v2232_v36 = vadd.f32 %v2458_v22, %v4207_v25 }
 0x5a7   :  { %v2460_v59 = vpop.f32.mrf.mxu1 }
 0x5a8   :  { %2280 = vst [vmem:[#allocation16 + $0x28] sm:$0xff] %v2232_v36  ;;  %v2461_v51 = vadd.f32 %v2460_v59, %v2459_v54 }
 0x5a9   :  { %v2462_v14 = vpop.f32.mrf.mxu1 }
 0x5aa   :  { %v2237_v30 = vadd.f32 %v2461_v51, %v4207_v25 }
 0x5ab   :  { %v2463_v38 = vpop.f32.mrf.mxu1 }
 0x5ac   :  { %2281 = vst [vmem:[#allocation16 + $0x30] sm:$0xff] %v2237_v30  ;;  %v2464_v42 = vadd.f32 %v2463_v38, %v2462_v14 }
 0x5ad   :  { %v2465_v39 = vpop.f32.mrf.mxu1 }
 0x5ae   :  { %v2240_v19 = vadd.f32 %v2464_v42, %v4207_v25 }
 0x5af   :  { %v2466_v33 = vpop.f32.mrf.mxu1 }
 0x5b0   :  { %2282 = vst [vmem:[#allocation16 + $0x38] sm:$0xff] %v2240_v19  ;;  %v2467_v1 = vadd.f32 %v2466_v33, %v2465_v39 }
 0x5b1   :  { %v2468_v32 = vpop.f32.mrf.mxu1 }
 0x5b2   :  { %v2245_v17 = vadd.f32 %v2467_v1, %v4207_v25 }
 0x5b3   :  { %v2469_v12 = vpop.f32.mrf.mxu1 }
 0x5b4   :  { %2283 = vst [vmem:[#allocation16 + $0x40] sm:$0xff] %v2245_v17  ;;  %v2470_v4 = vadd.f32 %v2469_v12, %v2468_v32 }
 0x5b5   :  { %v2471_v8 = vpop.f32.mrf.mxu1 }
 0x5b6   :  { %v2248_v13 = vadd.f32 %v2470_v4, %v4207_v25 }
 0x5b7   :  { %v2472_v44 = vpop.f32.mrf.mxu1 }
 0x5b8   :  { %2284 = vst [vmem:[#allocation16 + $0x48] sm:$0xff] %v2248_v13  ;;  %v2473_v57 = vadd.f32 %v2472_v44, %v2471_v8 }
 0x5b9   :  { %v2474_v31 = vpop.f32.mrf.mxu1 }
 0x5ba   :  { %v2253_v10 = vadd.f32 %v2473_v57, %v4207_v25 }
 0x5bb   :  { %v2475_v45 = vpop.f32.mrf.mxu1 }
 0x5bc   :  { %2285 = vst [vmem:[#allocation16 + $0x50] sm:$0xff] %v2253_v10  ;;  %v2476_v26 = vadd.f32 %v2475_v45, %v2474_v31 }
 0x5bd   :  { %v2477_v29 = vpop.f32.mrf.mxu1 }
 0x5be   :  { %v2256_v21 = vadd.f32 %v2476_v26, %v4207_v25 }
 0x5bf   :  { %v2478_v53 = vpop.f32.mrf.mxu1 }
 0x5c0   :  { %2286 = vst [vmem:[#allocation16 + $0x58] sm:$0xff] %v2256_v21  ;;  %v2479_v60 = vadd.f32 %v2478_v53, %v2477_v29 }
 0x5c1   :  { %v2480_v47 = vpop.f32.mrf.mxu1 }
 0x5c2   :  { %v2261_v27 = vadd.f32 %v2479_v60, %v4207_v25 }
 0x5c3   :  { %v2481_v56 = vpop.f32.mrf.mxu1 }
 0x5c4   :  { %2287 = vst [vmem:[#allocation16 + $0x60] sm:$0xff] %v2261_v27  ;;  %v2482_v63 = vadd.f32 %v2481_v56, %v2480_v47 }
 0x5c5   :  { %v2483_v9 = vpop.f32.mrf.mxu1 }
 0x5c6   :  { %v2264_v2 = vadd.f32 %v2482_v63, %v4207_v25 }
 0x5c7   :  { %v2484_v24 = vpop.f32.mrf.mxu1 }
 0x5c8   :  { %2288 = vst [vmem:[#allocation16 + $0x68] sm:$0xff] %v2264_v2  ;;  %v2485_v23 = vadd.f32 %v2484_v24, %v2483_v9 }
 0x5c9   :  { %v2486_v61 = vpop.f32.mrf.mxu1 }
 0x5ca   :  { %v2269_v52 = vadd.f32 %v2485_v23, %v4207_v25 }
 0x5cb   :  { %v2487_v46 = vpop.f32.mrf.mxu1 }
 0x5cc   :  { %2289 = vst [vmem:[#allocation16 + $0x70] sm:$0xff] %v2269_v52  ;;  %v2488_v11 = vadd.f32 %v2487_v46, %v2486_v61 }
 0x5ce   :  { %v2272_v35 = vadd.f32 %v2488_v11, %v4207_v25 }
 0x5d0   :  { %2290 = vst [vmem:[#allocation16 + $0x78] sm:$0xff] %v2272_v35 }
 0x5d1   :  { %2848 = shalt.err (!%p2845_p2)
}
 0x5d2   :  { %2302 = dma.vmem_to_hbm [thread:$0]  %s2297_s7, 2048, %s4243_s12, [#allocation4], %s2870_s24, %s2870_s24, %s2871_s25  }
 0x5d3   :  { %2867 = dma.done.wait [#allocation4], 2048  }
 0x5d4   :  { %2868 = vsyncadd [#allocation4], 4294965248 }
 0x5d5   :  { %2306 = vsyncpa [#allocation3], 1 }
 0x5d6   :  { %2307 = vsyncpa [#allocation6], 1 }
 0x5d7   :  { %2308 = vsyncpa [#allocation9], 1 }
 0x5d8   :  { %2309 = vsyncpa [#allocation12], 1 }
 0x5d9   :  { %2310 = vsyncpa [#allocation15], 1 }
 0x5da   :  { %2311 = vsyncpa [#allocation4], 1 }

</bundles_post_ra>
